<compile_context>
chip_gen: v7x
topology: tpu7x:2x2x1
jax: 0.10.0
libtpu: 0.0.40
codegen_flags: <defaults>
</compile_context>

<pallas_src>
import functools

import jax
import jax.numpy as jnp
from jax.experimental import pallas as pl
from jax.experimental.pallas import tpu as pltpu

_HAS_BUFFERED = hasattr(pl, "Buffered")


# -----------------------------------------------------------------------------
# Fused Pallas kernel: the entire GCN_Dense_Att forward in one invocation.
# -----------------------------------------------------------------------------
def _fused_gcn_kernel(att_a_ref, att_r_ref,             # scalar prefetch (SMEM)
                      a_stack_ref, r_stack_ref, x_ref,  # VMEM inputs
                      *refs,                             # W0, b0, W1, b1, ..., out
                      relu_flags, reassoc_flags, d, use_bf16_matmul):
    out_ref = refs[-1]
    wb_refs = refs[:-1]
    n_layers = len(relu_flags)

    def mm(a, b):
        # MXU matmul, f32 accumulation.  Operand cast to bf16 is the main
        # compute lever; cast only at the matmul boundary.
        if use_bf16_matmul:
            a = a.astype(jnp.bfloat16)
            b = b.astype(jnp.bfloat16)
        return jnp.dot(a, b, preferred_element_type=jnp.float32)

    # Effective adjacency per side:  A_eff = sum_k softmax(att)[k] * adj_k.
    # Linearity turns d MXU matmuls per layer into one; the weighted sum over
    # the small (d, n, n) stack is a handful of VPU ops (att scalars in SMEM).
    a_eff = None
    r_eff = None
    if n_layers >= 1:
        a_eff = att_a_ref[0] * a_stack_ref[0]
        for k in range(1, d):
            a_eff = a_eff + att_a_ref[k] * a_stack_ref[k]
    if n_layers >= 2:
        r_eff = att_r_ref[0] * r_stack_ref[0]
        for k in range(1, d):
            r_eff = r_eff + att_r_ref[k] * r_stack_ref[k]

    # Row sums only needed for reassociated (expanding) layers (one XLU reduce).
    need_a_rs = any(f for li, f in enumerate(reassoc_flags) if li % 2 == 0)
    need_r_rs = any(f for li, f in enumerate(reassoc_flags) if li % 2 == 1)
    a_rs = jnp.sum(a_eff, axis=-1, keepdims=True) if need_a_rs else None
    r_rs = jnp.sum(r_eff, axis=-1, keepdims=True) if need_r_rs else None

    # All GraphConv layers fused; intermediate activations never touch HBM.
    h = x_ref[...]
    for li, (relu, reassoc) in enumerate(zip(relu_flags, reassoc_flags)):
        w = wb_refs[2 * li][...]
        b = wb_refs[2 * li + 1][...]
        use_a = (li % 2 == 0)
        adj = a_eff if use_a else r_eff
        if reassoc:
            # Expanding layer (in_c < out_c):
            #   adj @ (h @ W + b) == (adj @ h) @ W + rowsum(adj)[:,None] * b
            rs = a_rs if use_a else r_rs
            h = mm(mm(adj, h), w) + rs * b
        else:
            support = mm(h, w) + b                      # x @ W + b
            h = mm(adj, support)                        # A_eff @ support
        if relu:
            h = jnp.where(h >= 0.0, h, 0.2 * h)         # LeakyReLU(0.2)

    # F.normalize: row-wise L2, eps = 1e-12 (max(sumsq, eps^2) == max(norm, eps)
    # under the sqrt).  rsqrt lands on the EUP slot.
    sumsq = jnp.sum(h * h, axis=-1, keepdims=True)
    h = h * jax.lax.rsqrt(jnp.maximum(sumsq, 1e-24))
    out_ref[...] = h.astype(out_ref.dtype)


def gcn_dense_att_forward(x, a_adj, r_adj, att_a_sm, att_r_sm, layer_params,
                          *, use_bf16_matmul=True):
    """Fused GCN_Dense_Att forward: one pallas_call for all layers."""
    n, in_c = x.shape
    d = a_adj.shape[0]
    relu_flags = tuple(bool(relu) for (_, _, relu) in layer_params)
    reassoc_flags = tuple(w.shape[0] < w.shape[1] for (w, _, _) in layer_params)
    out_c = layer_params[-1][0].shape[1]

    # Advisory cost estimate for XLA's scheduler (matmul flops per chosen path).
    flops = 0
    for (w, _, _), reassoc in zip(layer_params, reassoc_flags):
        ic, oc = w.shape
        if reassoc:
            flops += 2 * n * n * ic + 2 * n * ic * oc
        else:
            flops += 2 * n * ic * oc + 2 * n * n * oc
    bytes_accessed = 4 * (int(a_adj.size) + int(r_adj.size) + int(x.size)
                          + n * out_c
                          + sum(int(w.size) + int(b.size)
                                for (w, b, _) in layer_params))
    cost = pl.CostEstimate(flops=int(flops), transcendentals=int(n),
                           bytes_accessed=int(bytes_accessed))

    wb_flat, wb_shapes = [], []
    for (w, b, _) in layer_params:
        b2 = b.reshape(1, -1)
        wb_flat.extend([w, b2])
        wb_shapes.extend([w.shape, b2.shape])

    kernel = functools.partial(_fused_gcn_kernel,
                               relu_flags=relu_flags,
                               reassoc_flags=reassoc_flags,
                               d=d, use_bf16_matmul=use_bf16_matmul)

    def build(single_buffer):
        def spec(shape):
            kwargs = {}
            if single_buffer and _HAS_BUFFERED:
                # grid=(1,): double-buffering the resident inputs is pure VMEM
                # waste (biggest saver for the (d,n,n) stacks on v7x's 64 MiB).
                kwargs["pipeline_mode"] = pl.Buffered(1)
            return pl.BlockSpec(shape, lambda i, aa, ar: (0,) * len(shape),
                                **kwargs)

        in_specs = [spec((d, n, n)),        # a adjacency stack
                    spec((d, n, n)),        # r adjacency stack
                    spec((n, in_c))]        # x
        in_specs += [spec(s) for s in wb_shapes]   # W/b per layer

        return pl.pallas_call(
            kernel,
            out_shape=jax.ShapeDtypeStruct((n, out_c), jnp.float32),
            grid_spec=pltpu.PrefetchScalarGridSpec(
                num_scalar_prefetch=2,      # softmaxed a_att, r_att -> SMEM
                grid=(1,),                  # single fused invocation
                in_specs=in_specs,
                out_specs=pl.BlockSpec((n, out_c), lambda i, aa, ar: (0, 0)),
            ),
            compiler_params=pltpu.CompilerParams(
                dimension_semantics=("arbitrary",)),
            cost_estimate=cost,
        )

    args = (att_a_sm, att_r_sm, a_adj, r_adj, x, *wb_flat)
    if _HAS_BUFFERED:
        try:
            return jax.block_until_ready(build(single_buffer=True)(*args))
        except Exception:
            # pipeline_mode / Buffered(1) not supported on this jax version:
            # fall back to default double-buffered BlockSpecs (same semantics).
            pass
    return build(single_buffer=False)(*args)


# -----------------------------------------------------------------------------
# Module setup glue (deterministic params, dense normalized adjacencies).
# -----------------------------------------------------------------------------
def normt_in_dense(adj):
    """Dense equivalent of normt_spm(mx, method='in'): row-normalize(mx.T)."""
    mx = adj.T
    rowsum = mx.sum(axis=1)
    r_inv = jnp.where(rowsum > 0, 1.0 / rowsum, 0.0)
    return r_inv[:, None] * mx


def build_dense_adj(edges, n):
    """Dense equivalent of sp.coo_matrix((ones, (rows, cols)), shape=(n,n))."""
    adj = jnp.zeros((n, n), jnp.float32)
    return adj.at[edges[:, 0], edges[:, 1]].add(1.0)


def xavier_uniform(key, shape):
    fan_in, fan_out = shape
    bound = (6.0 / (fan_in + fan_out)) ** 0.5
    return jax.random.uniform(key, shape, jnp.float32, -bound, bound)


class GCNDenseAttPallas:
    """JAX/Pallas re-implementation of GCN_Dense_Att forward (fused kernel)."""

    def __init__(self, n, edges_set, in_channels, out_channels, hidden_layers,
                 key):
        self.n = n
        self.d = len(edges_set)

        a_adjs, r_adjs = [], []
        for edges in edges_set:
            adj = build_dense_adj(jnp.asarray(edges, jnp.int32), n)
            a_adjs.append(normt_in_dense(adj))       # normt_spm(adj, 'in')
            r_adjs.append(normt_in_dense(adj.T))     # normt_spm(adj.T, 'in')
        self.a_adj = jnp.stack(a_adjs)               # (d, n, n)
        self.r_adj = jnp.stack(r_adjs)               # (d, n, n)

        self.a_att = jnp.ones((self.d,), jnp.float32)
        self.r_att = jnp.ones((self.d,), jnp.float32)

        hl = hidden_layers.split(',')
        if hl[-1] == 'd':
            hl = hl[:-1]
        # TODO(synk): nn.Dropout (the 'd' markers) omitted — inference-mode
        # dropout is the identity, and the chosen config has no dropout.
        hl = [int(c[1:]) if c[0] == 'd' else int(c) for c in hl]

        self.layer_params = []  # list of (W, b, relu)
        last_c = in_channels
        keys = jax.random.split(key, len(hl) + 1)
        for i, c in enumerate(hl):
            w = xavier_uniform(keys[i], (last_c, c))
            b = jnp.zeros((c,), jnp.float32)
            self.layer_params.append((w, b, True))
            last_c = c
        w = xavier_uniform(keys[-1], (last_c, out_channels))
        b = jnp.zeros((out_channels,), jnp.float32)
        self.layer_params.append((w, b, False))

    def __call__(self, x, *, use_bf16_matmul=True):
        att_a_sm = jax.nn.softmax(self.a_att, axis=0)
        att_r_sm = jax.nn.softmax(self.r_att, axis=0)
        return gcn_dense_att_forward(x, self.a_adj, self.r_adj,
                                     att_a_sm, att_r_sm, self.layer_params,
                                     use_bf16_matmul=use_bf16_matmul)

    # pure-JAX f32 reference for correctness checking
    def reference(self, x):
        graph_side = True
        for w, b, relu in self.layer_params:
            adj_stack, att = (self.a_adj, self.a_att) if graph_side else \
                             (self.r_adj, self.r_att)
            att_sm = jax.nn.softmax(att, axis=0)
            support = x @ w + b
            out = jnp.einsum('dij,jk->ik', adj_stack * att_sm[:, None, None],
                             support)
            if relu:
                out = jnp.where(out >= 0.0, out, 0.2 * out)
            x = out
            graph_side = not graph_side
        norm = jnp.sqrt(jnp.sum(x * x, axis=-1, keepdims=True))
        return x / jnp.maximum(norm, 1e-12)


# -----------------------------------------------------------------------------
if __name__ == "__main__":
    key = jax.random.PRNGKey(0)
    k_x, k_params = jax.random.split(key, 2)

    n = 64            # number of graph nodes
    in_channels = 32
    out_channels = 32
    hidden_layers = "64"   # one hidden GraphConv(32 -> 64), then conv-last
    d = 2                  # two edge sets

    # deterministic edge sets (ring + skip connections)
    idx = jnp.arange(n, dtype=jnp.int32)
    edges0 = jnp.stack([idx, (idx + 1) % n], axis=1)
    edges1 = jnp.stack([idx, (idx + 3) % n], axis=1)
    edges_set = [edges0, edges1]

    model = GCNDenseAttPallas(n, edges_set, in_channels, out_channels,
                              hidden_layers, k_params)

    x = jax.random.normal(k_x, (n, in_channels), jnp.float32)
    ref = model.reference(x)

    # Exact-precision path (f32 MXU operands): tight check vs. f32 reference.
    out_f32 = jax.block_until_ready(model(x, use_bf16_matmul=False))
    assert out_f32.shape == (n, out_channels)
    assert jnp.allclose(out_f32, ref, atol=1e-4, rtol=1e-4), \
        f"f32 path max abs err {jnp.max(jnp.abs(out_f32 - ref))}"

    # Default fast path (bf16 MXU operands, f32 accumulation): loosened check.
    out = jax.block_until_ready(model(x))
    assert out.shape == (n, out_channels)
    assert jnp.allclose(out, ref, atol=2e-2, rtol=2e-2), \
        f"bf16 path max abs err {jnp.max(jnp.abs(out - ref))}"

    print("KERNEL_OK")
</pallas_src>

<mosaic_0001>
module attributes {stable_mosaic.version = 11 : i64} {
  func.func @_fused_gcn_kernel(%arg0: i32, %arg1: memref<2xf32, #tpu.memory_space<smem>>, %arg2: memref<2xf32, #tpu.memory_space<smem>>, %arg3: memref<2x64x64xf32, #tpu.memory_space<vmem>>, %arg4: memref<2x64x64xf32, #tpu.memory_space<vmem>>, %arg5: memref<64x32xf32, #tpu.memory_space<vmem>>, %arg6: memref<32x64xf32, #tpu.memory_space<vmem>>, %arg7: memref<1x64xf32, #tpu.memory_space<vmem>>, %arg8: memref<64x32xf32, #tpu.memory_space<vmem>>, %arg9: memref<1x32xf32, #tpu.memory_space<vmem>>, %arg10: memref<64x32xf32, #tpu.memory_space<vmem>>) attributes {dimension_semantics = [#tpu.dimension_semantics<arbitrary>], iteration_bounds = array<i64: 1>, scalar_prefetch = 2 : i64, scratch_operands = 0 : i64, tpu.core_type = #tpu.core_type<tc>, window_params = [{pipeline_mode = #tpu.pipeline_mode<synchronous>, transform_indices = @transform_0, window_bounds = array<i64: 2, 64, 64>}, {pipeline_mode = #tpu.pipeline_mode<synchronous>, transform_indices = @transform_1, window_bounds = array<i64: 2, 64, 64>}, {pipeline_mode = #tpu.pipeline_mode<synchronous>, transform_indices = @transform_2, window_bounds = array<i64: 64, 32>}, {pipeline_mode = #tpu.pipeline_mode<synchronous>, transform_indices = @transform_3, window_bounds = array<i64: 32, 64>}, {pipeline_mode = #tpu.pipeline_mode<synchronous>, transform_indices = @transform_4, window_bounds = array<i64: 1, 64>}, {pipeline_mode = #tpu.pipeline_mode<synchronous>, transform_indices = @transform_5, window_bounds = array<i64: 64, 32>}, {pipeline_mode = #tpu.pipeline_mode<synchronous>, transform_indices = @transform_6, window_bounds = array<i64: 1, 32>}, {pipeline_mode = #tpu.pipeline_mode<synchronous>, transform_indices = @transform_7, window_bounds = array<i64: 64, 32>}]} {
    %c0 = arith.constant 0 : index
    %0 = memref.load %arg1[%c0] : memref<2xf32, #tpu.memory_space<smem>>
    %c0_0 = arith.constant 0 : index
    %c0_1 = arith.constant 0 : index
    %c0_2 = arith.constant 0 : index
    %1 = vector.load %arg3[%c0_0, %c0_1, %c0_2] : memref<2x64x64xf32, #tpu.memory_space<vmem>>, vector<1x64x64xf32>
    %2 = vector.shape_cast %1 : vector<1x64x64xf32> to vector<64x64xf32>
    %3 = vector.broadcast %0 : f32 to vector<64x64xf32>
    %4 = arith.mulf %3, %2 : vector<64x64xf32>
    %c1 = arith.constant 1 : index
    %5 = memref.load %arg1[%c1] : memref<2xf32, #tpu.memory_space<smem>>
    %c1_3 = arith.constant 1 : index
    %c0_4 = arith.constant 0 : index
    %c0_5 = arith.constant 0 : index
    %6 = vector.load %arg3[%c1_3, %c0_4, %c0_5] : memref<2x64x64xf32, #tpu.memory_space<vmem>>, vector<1x64x64xf32>
    %7 = vector.shape_cast %6 : vector<1x64x64xf32> to vector<64x64xf32>
    %8 = vector.broadcast %5 : f32 to vector<64x64xf32>
    %9 = arith.mulf %8, %7 : vector<64x64xf32>
    %10 = arith.addf %4, %9 : vector<64x64xf32>
    %c0_6 = arith.constant 0 : index
    %11 = memref.load %arg2[%c0_6] : memref<2xf32, #tpu.memory_space<smem>>
    %c0_7 = arith.constant 0 : index
    %c0_8 = arith.constant 0 : index
    %c0_9 = arith.constant 0 : index
    %12 = vector.load %arg4[%c0_7, %c0_8, %c0_9] : memref<2x64x64xf32, #tpu.memory_space<vmem>>, vector<1x64x64xf32>
    %13 = vector.shape_cast %12 : vector<1x64x64xf32> to vector<64x64xf32>
    %14 = vector.broadcast %11 : f32 to vector<64x64xf32>
    %15 = arith.mulf %14, %13 : vector<64x64xf32>
    %c1_10 = arith.constant 1 : index
    %16 = memref.load %arg2[%c1_10] : memref<2xf32, #tpu.memory_space<smem>>
    %c1_11 = arith.constant 1 : index
    %c0_12 = arith.constant 0 : index
    %c0_13 = arith.constant 0 : index
    %17 = vector.load %arg4[%c1_11, %c0_12, %c0_13] : memref<2x64x64xf32, #tpu.memory_space<vmem>>, vector<1x64x64xf32>
    %18 = vector.shape_cast %17 : vector<1x64x64xf32> to vector<64x64xf32>
    %19 = vector.broadcast %16 : f32 to vector<64x64xf32>
    %20 = arith.mulf %19, %18 : vector<64x64xf32>
    %21 = arith.addf %15, %20 : vector<64x64xf32>
    %cst = arith.constant dense<0.000000e+00> : vector<64xf32>
    %22 = vector.multi_reduction <add>, %10, %cst [1] : vector<64x64xf32> to vector<64xf32>
    %23 = vector.shape_cast %22 : vector<64xf32> to vector<64x1xf32>
    %c0_14 = arith.constant 0 : index
    %c0_15 = arith.constant 0 : index
    %24 = vector.load %arg5[%c0_14, %c0_15] : memref<64x32xf32, #tpu.memory_space<vmem>>, vector<64x32xf32>
    %c0_16 = arith.constant 0 : index
    %c0_17 = arith.constant 0 : index
    %25 = vector.load %arg6[%c0_16, %c0_17] : memref<32x64xf32, #tpu.memory_space<vmem>>, vector<32x64xf32>
    %c0_18 = arith.constant 0 : index
    %c0_19 = arith.constant 0 : index
    %26 = vector.load %arg7[%c0_18, %c0_19] : memref<1x64xf32, #tpu.memory_space<vmem>>, vector<1x64xf32>
    %cst_20 = arith.constant dense<0.000000e+00> : vector<64x32xf32>
    %27 = tpu.matmul %10, %24, %cst_20 {dimension_numbers = #tpu.dot_dimension_numbers<[1], [0], [0], [1], [0, 0, 1, 1], [], []>} : vector<64x64xf32>, vector<64x32xf32>, vector<64x32xf32> -> vector<64x32xf32>
    %cst_21 = arith.constant dense<0.000000e+00> : vector<64x64xf32>
    %28 = tpu.matmul %27, %25, %cst_21 {dimension_numbers = #tpu.dot_dimension_numbers<[1], [0], [0], [1], [0, 0, 1, 1], [], []>} : vector<64x32xf32>, vector<32x64xf32>, vector<64x64xf32> -> vector<64x64xf32>
    %29 = vector.broadcast %23 : vector<64x1xf32> to vector<64x64xf32>
    %30 = vector.broadcast %26 : vector<1x64xf32> to vector<64x64xf32>
    %31 = arith.mulf %29, %30 : vector<64x64xf32>
    %32 = arith.addf %28, %31 : vector<64x64xf32>
    %cst_22 = arith.constant 0.000000e+00 : f32
    %33 = vector.broadcast %cst_22 : f32 to vector<64x64xf32>
    %34 = arith.cmpf oge, %32, %33 : vector<64x64xf32>
    %cst_23 = arith.constant 2.000000e-01 : f32
    %35 = vector.broadcast %cst_23 : f32 to vector<64x64xf32>
    %36 = arith.mulf %35, %32 : vector<64x64xf32>
    %37 = arith.select %34, %32, %36 : vector<64x64xi1>, vector<64x64xf32>
    %c0_24 = arith.constant 0 : index
    %c0_25 = arith.constant 0 : index
    %38 = vector.load %arg8[%c0_24, %c0_25] : memref<64x32xf32, #tpu.memory_space<vmem>>, vector<64x32xf32>
    %c0_26 = arith.constant 0 : index
    %c0_27 = arith.constant 0 : index
    %39 = vector.load %arg9[%c0_26, %c0_27] : memref<1x32xf32, #tpu.memory_space<vmem>>, vector<1x32xf32>
    %cst_28 = arith.constant dense<0.000000e+00> : vector<64x32xf32>
    %40 = tpu.matmul %37, %38, %cst_28 {dimension_numbers = #tpu.dot_dimension_numbers<[1], [0], [0], [1], [0, 0, 1, 1], [], []>} : vector<64x64xf32>, vector<64x32xf32>, vector<64x32xf32> -> vector<64x32xf32>
    %41 = vector.broadcast %39 : vector<1x32xf32> to vector<64x32xf32>
    %42 = arith.addf %40, %41 : vector<64x32xf32>
    %cst_29 = arith.constant dense<0.000000e+00> : vector<64x32xf32>
    %43 = tpu.matmul %21, %42, %cst_29 {dimension_numbers = #tpu.dot_dimension_numbers<[1], [0], [0], [1], [0, 0, 1, 1], [], []>} : vector<64x64xf32>, vector<64x32xf32>, vector<64x32xf32> -> vector<64x32xf32>
    %44 = arith.mulf %43, %43 : vector<64x32xf32>
    %cst_30 = arith.constant dense<0.000000e+00> : vector<64xf32>
    %45 = vector.multi_reduction <add>, %44, %cst_30 [1] : vector<64x32xf32> to vector<64xf32>
    %46 = vector.shape_cast %45 : vector<64xf32> to vector<64x1xf32>
    %cst_31 = arith.constant 1.000000e-24 : f32
    %47 = vector.broadcast %cst_31 : f32 to vector<64x1xf32>
    %48 = arith.maximumf %46, %47 : vector<64x1xf32>
    %49 = math.rsqrt %48 : vector<64x1xf32>
    %50 = vector.broadcast %49 : vector<64x1xf32> to vector<64x32xf32>
    %51 = arith.mulf %43, %50 : vector<64x32xf32>
    %c0_32 = arith.constant 0 : index
    %c0_33 = arith.constant 0 : index
    %52 = vector.load %arg10[%c0_32, %c0_33] : memref<64x32xf32, #tpu.memory_space<vmem>>, vector<64x32xf32>
    tpu.vector_store %arg10[%c0_32, %c0_33], %51 {strides = array<i32>} : memref<64x32xf32, #tpu.memory_space<vmem>>, vector<64x32xf32>,
    return
  }
  func.func @transform_0(%arg0: i32, %arg1: memref<2xf32, #tpu.memory_space<smem>>, %arg2: memref<2xf32, #tpu.memory_space<smem>>) -> (i32, i32, i32) {
    %c0_i32 = arith.constant 0 : i32
    %c0_i32_0 = arith.constant 0 : i32
    %c0_i32_1 = arith.constant 0 : i32
    %c0_i32_2 = arith.constant 0 : i32
    return %c0_i32, %c0_i32_0, %c0_i32_1 : i32, i32, i32
  }
  func.func @transform_1(%arg0: i32, %arg1: memref<2xf32, #tpu.memory_space<smem>>, %arg2: memref<2xf32, #tpu.memory_space<smem>>) -> (i32, i32, i32) {
    %c0_i32 = arith.constant 0 : i32
    %c0_i32_0 = arith.constant 0 : i32
    %c0_i32_1 = arith.constant 0 : i32
    %c0_i32_2 = arith.constant 0 : i32
    return %c0_i32, %c0_i32_0, %c0_i32_1 : i32, i32, i32
  }
  func.func @transform_2(%arg0: i32, %arg1: memref<2xf32, #tpu.memory_space<smem>>, %arg2: memref<2xf32, #tpu.memory_space<smem>>) -> (i32, i32) {
    %c0_i32 = arith.constant 0 : i32
    %c0_i32_0 = arith.constant 0 : i32
    %c0_i32_1 = arith.constant 0 : i32
    return %c0_i32, %c0_i32_0 : i32, i32
  }
  func.func @transform_3(%arg0: i32, %arg1: memref<2xf32, #tpu.memory_space<smem>>, %arg2: memref<2xf32, #tpu.memory_space<smem>>) -> (i32, i32) {
    %c0_i32 = arith.constant 0 : i32
    %c0_i32_0 = arith.constant 0 : i32
    %c0_i32_1 = arith.constant 0 : i32
    return %c0_i32, %c0_i32_0 : i32, i32
  }
  func.func @transform_4(%arg0: i32, %arg1: memref<2xf32, #tpu.memory_space<smem>>, %arg2: memref<2xf32, #tpu.memory_space<smem>>) -> (i32, i32) {
    %c0_i32 = arith.constant 0 : i32
    %c0_i32_0 = arith.constant 0 : i32
    %c0_i32_1 = arith.constant 0 : i32
    return %c0_i32, %c0_i32_0 : i32, i32
  }
  func.func @transform_5(%arg0: i32, %arg1: memref<2xf32, #tpu.memory_space<smem>>, %arg2: memref<2xf32, #tpu.memory_space<smem>>) -> (i32, i32) {
    %c0_i32 = arith.constant 0 : i32
    %c0_i32_0 = arith.constant 0 : i32
    %c0_i32_1 = arith.constant 0 : i32
    return %c0_i32, %c0_i32_0 : i32, i32
  }
  func.func @transform_6(%arg0: i32, %arg1: memref<2xf32, #tpu.memory_space<smem>>, %arg2: memref<2xf32, #tpu.memory_space<smem>>) -> (i32, i32) {
    %c0_i32 = arith.constant 0 : i32
    %c0_i32_0 = arith.constant 0 : i32
    %c0_i32_1 = arith.constant 0 : i32
    return %c0_i32, %c0_i32_0 : i32, i32
  }
  func.func @transform_7(%arg0: i32, %arg1: memref<2xf32, #tpu.memory_space<smem>>, %arg2: memref<2xf32, #tpu.memory_space<smem>>) -> (i32, i32) {
    %c0_i32 = arith.constant 0 : i32
    %c0_i32_0 = arith.constant 0 : i32
    %c0_i32_1 = arith.constant 0 : i32
    return %c0_i32, %c0_i32_0 : i32, i32
  }
}

module attributes {stable_mosaic.version = 11 : i64} {
  func.func @_fused_gcn_kernel(%arg0: i32, %arg1: memref<2xf32, #tpu.memory_space<smem>>, %arg2: memref<2xf32, #tpu.memory_space<smem>>, %arg3: memref<2x64x64xf32, #tpu.memory_space<vmem>>, %arg4: memref<2x64x64xf32, #tpu.memory_space<vmem>>, %arg5: memref<64x32xf32, #tpu.memory_space<vmem>>, %arg6: memref<32x64xf32, #tpu.memory_space<vmem>>, %arg7: memref<1x64xf32, #tpu.memory_space<vmem>>, %arg8: memref<64x32xf32, #tpu.memory_space<vmem>>, %arg9: memref<1x32xf32, #tpu.memory_space<vmem>>, %arg10: memref<64x32xf32, #tpu.memory_space<vmem>>) attributes {dimension_semantics = [#tpu.dimension_semantics<arbitrary>], iteration_bounds = array<i64: 1>, scalar_prefetch = 2 : i64, scratch_operands = 0 : i64, tpu.core_type = #tpu.core_type<tc>, window_params = [{pipeline_mode = #tpu.pipeline_mode<synchronous>, transform_indices = @transform_0, window_bounds = array<i64: 2, 64, 64>}, {pipeline_mode = #tpu.pipeline_mode<synchronous>, transform_indices = @transform_1, window_bounds = array<i64: 2, 64, 64>}, {pipeline_mode = #tpu.pipeline_mode<synchronous>, transform_indices = @transform_2, window_bounds = array<i64: 64, 32>}, {pipeline_mode = #tpu.pipeline_mode<synchronous>, transform_indices = @transform_3, window_bounds = array<i64: 32, 64>}, {pipeline_mode = #tpu.pipeline_mode<synchronous>, transform_indices = @transform_4, window_bounds = array<i64: 1, 64>}, {pipeline_mode = #tpu.pipeline_mode<synchronous>, transform_indices = @transform_5, window_bounds = array<i64: 64, 32>}, {pipeline_mode = #tpu.pipeline_mode<synchronous>, transform_indices = @transform_6, window_bounds = array<i64: 1, 32>}, {pipeline_mode = #tpu.pipeline_mode<synchronous>, transform_indices = @transform_7, window_bounds = array<i64: 64, 32>}]} {
    %c0 = arith.constant 0 : index
    %0 = memref.load %arg1[%c0] : memref<2xf32, #tpu.memory_space<smem>>
    %c0_0 = arith.constant 0 : index
    %c0_1 = arith.constant 0 : index
    %c0_2 = arith.constant 0 : index
    %1 = vector.load %arg3[%c0_0, %c0_1, %c0_2] : memref<2x64x64xf32, #tpu.memory_space<vmem>>, vector<1x64x64xf32>
    %2 = vector.shape_cast %1 : vector<1x64x64xf32> to vector<64x64xf32>
    %3 = vector.broadcast %0 : f32 to vector<64x64xf32>
    %4 = arith.mulf %3, %2 : vector<64x64xf32>
    %c1 = arith.constant 1 : index
    %5 = memref.load %arg1[%c1] : memref<2xf32, #tpu.memory_space<smem>>
    %c1_3 = arith.constant 1 : index
    %c0_4 = arith.constant 0 : index
    %c0_5 = arith.constant 0 : index
    %6 = vector.load %arg3[%c1_3, %c0_4, %c0_5] : memref<2x64x64xf32, #tpu.memory_space<vmem>>, vector<1x64x64xf32>
    %7 = vector.shape_cast %6 : vector<1x64x64xf32> to vector<64x64xf32>
    %8 = vector.broadcast %5 : f32 to vector<64x64xf32>
    %9 = arith.mulf %8, %7 : vector<64x64xf32>
    %10 = arith.addf %4, %9 : vector<64x64xf32>
    %c0_6 = arith.constant 0 : index
    %11 = memref.load %arg2[%c0_6] : memref<2xf32, #tpu.memory_space<smem>>
    %c0_7 = arith.constant 0 : index
    %c0_8 = arith.constant 0 : index
    %c0_9 = arith.constant 0 : index
    %12 = vector.load %arg4[%c0_7, %c0_8, %c0_9] : memref<2x64x64xf32, #tpu.memory_space<vmem>>, vector<1x64x64xf32>
    %13 = vector.shape_cast %12 : vector<1x64x64xf32> to vector<64x64xf32>
    %14 = vector.broadcast %11 : f32 to vector<64x64xf32>
    %15 = arith.mulf %14, %13 : vector<64x64xf32>
    %c1_10 = arith.constant 1 : index
    %16 = memref.load %arg2[%c1_10] : memref<2xf32, #tpu.memory_space<smem>>
    %c1_11 = arith.constant 1 : index
    %c0_12 = arith.constant 0 : index
    %c0_13 = arith.constant 0 : index
    %17 = vector.load %arg4[%c1_11, %c0_12, %c0_13] : memref<2x64x64xf32, #tpu.memory_space<vmem>>, vector<1x64x64xf32>
    %18 = vector.shape_cast %17 : vector<1x64x64xf32> to vector<64x64xf32>
    %19 = vector.broadcast %16 : f32 to vector<64x64xf32>
    %20 = arith.mulf %19, %18 : vector<64x64xf32>
    %21 = arith.addf %15, %20 : vector<64x64xf32>
    %cst = arith.constant dense<0.000000e+00> : vector<64xf32>
    %22 = vector.multi_reduction <add>, %10, %cst [1] : vector<64x64xf32> to vector<64xf32>
    %23 = vector.shape_cast %22 : vector<64xf32> to vector<64x1xf32>
    %c0_14 = arith.constant 0 : index
    %c0_15 = arith.constant 0 : index
    %24 = vector.load %arg5[%c0_14, %c0_15] : memref<64x32xf32, #tpu.memory_space<vmem>>, vector<64x32xf32>
    %c0_16 = arith.constant 0 : index
    %c0_17 = arith.constant 0 : index
    %25 = vector.load %arg6[%c0_16, %c0_17] : memref<32x64xf32, #tpu.memory_space<vmem>>, vector<32x64xf32>
    %c0_18 = arith.constant 0 : index
    %c0_19 = arith.constant 0 : index
    %26 = vector.load %arg7[%c0_18, %c0_19] : memref<1x64xf32, #tpu.memory_space<vmem>>, vector<1x64xf32>
    %cst_20 = arith.constant dense<0.000000e+00> : vector<64x32xf32>
    %27 = tpu.matmul %10, %24, %cst_20 {dimension_numbers = #tpu.dot_dimension_numbers<[1], [0], [0], [1], [0, 0, 1, 1], [], []>} : vector<64x64xf32>, vector<64x32xf32>, vector<64x32xf32> -> vector<64x32xf32>
    %cst_21 = arith.constant dense<0.000000e+00> : vector<64x64xf32>
    %28 = tpu.matmul %27, %25, %cst_21 {dimension_numbers = #tpu.dot_dimension_numbers<[1], [0], [0], [1], [0, 0, 1, 1], [], []>} : vector<64x32xf32>, vector<32x64xf32>, vector<64x64xf32> -> vector<64x64xf32>
    %29 = vector.broadcast %23 : vector<64x1xf32> to vector<64x64xf32>
    %30 = vector.broadcast %26 : vector<1x64xf32> to vector<64x64xf32>
    %31 = arith.mulf %29, %30 : vector<64x64xf32>
    %32 = arith.addf %28, %31 : vector<64x64xf32>
    %cst_22 = arith.constant 0.000000e+00 : f32
    %33 = vector.broadcast %cst_22 : f32 to vector<64x64xf32>
    %34 = arith.cmpf oge, %32, %33 : vector<64x64xf32>
    %cst_23 = arith.constant 2.000000e-01 : f32
    %35 = vector.broadcast %cst_23 : f32 to vector<64x64xf32>
    %36 = arith.mulf %35, %32 : vector<64x64xf32>
    %37 = arith.select %34, %32, %36 : vector<64x64xi1>, vector<64x64xf32>
    %c0_24 = arith.constant 0 : index
    %c0_25 = arith.constant 0 : index
    %38 = vector.load %arg8[%c0_24, %c0_25] : memref<64x32xf32, #tpu.memory_space<vmem>>, vector<64x32xf32>
    %c0_26 = arith.constant 0 : index
    %c0_27 = arith.constant 0 : index
    %39 = vector.load %arg9[%c0_26, %c0_27] : memref<1x32xf32, #tpu.memory_space<vmem>>, vector<1x32xf32>
    %cst_28 = arith.constant dense<0.000000e+00> : vector<64x32xf32>
    %40 = tpu.matmul %37, %38, %cst_28 {dimension_numbers = #tpu.dot_dimension_numbers<[1], [0], [0], [1], [0, 0, 1, 1], [], []>} : vector<64x64xf32>, vector<64x32xf32>, vector<64x32xf32> -> vector<64x32xf32>
    %41 = vector.broadcast %39 : vector<1x32xf32> to vector<64x32xf32>
    %42 = arith.addf %40, %41 : vector<64x32xf32>
    %cst_29 = arith.constant dense<0.000000e+00> : vector<64x32xf32>
    %43 = tpu.matmul %21, %42, %cst_29 {dimension_numbers = #tpu.dot_dimension_numbers<[1], [0], [0], [1], [0, 0, 1, 1], [], []>} : vector<64x64xf32>, vector<64x32xf32>, vector<64x32xf32> -> vector<64x32xf32>
    %44 = arith.mulf %43, %43 : vector<64x32xf32>
    %cst_30 = arith.constant dense<0.000000e+00> : vector<64xf32>
    %45 = vector.multi_reduction <add>, %44, %cst_30 [1] : vector<64x32xf32> to vector<64xf32>
    %46 = vector.shape_cast %45 : vector<64xf32> to vector<64x1xf32>
    %cst_31 = arith.constant 1.000000e-24 : f32
    %47 = vector.broadcast %cst_31 : f32 to vector<64x1xf32>
    %48 = arith.maximumf %46, %47 : vector<64x1xf32>
    %49 = math.rsqrt %48 : vector<64x1xf32>
    %50 = vector.broadcast %49 : vector<64x1xf32> to vector<64x32xf32>
    %51 = arith.mulf %43, %50 : vector<64x32xf32>
    %c0_32 = arith.constant 0 : index
    %c0_33 = arith.constant 0 : index
    %52 = vector.load %arg10[%c0_32, %c0_33] : memref<64x32xf32, #tpu.memory_space<vmem>>, vector<64x32xf32>
    tpu.vector_store %arg10[%c0_32, %c0_33], %51 {strides = array<i32>} : memref<64x32xf32, #tpu.memory_space<vmem>>, vector<64x32xf32>,
    return
  }
  func.func @transform_0(%arg0: i32, %arg1: memref<2xf32, #tpu.memory_space<smem>>, %arg2: memref<2xf32, #tpu.memory_space<smem>>) -> (i32, i32, i32) {
    %c0_i32 = arith.constant 0 : i32
    %c0_i32_0 = arith.constant 0 : i32
    %c0_i32_1 = arith.constant 0 : i32
    %c0_i32_2 = arith.constant 0 : i32
    return %c0_i32, %c0_i32_0, %c0_i32_1 : i32, i32, i32
  }
  func.func @transform_1(%arg0: i32, %arg1: memref<2xf32, #tpu.memory_space<smem>>, %arg2: memref<2xf32, #tpu.memory_space<smem>>) -> (i32, i32, i32) {
    %c0_i32 = arith.constant 0 : i32
    %c0_i32_0 = arith.constant 0 : i32
    %c0_i32_1 = arith.constant 0 : i32
    %c0_i32_2 = arith.constant 0 : i32
    return %c0_i32, %c0_i32_0, %c0_i32_1 : i32, i32, i32
  }
  func.func @transform_2(%arg0: i32, %arg1: memref<2xf32, #tpu.memory_space<smem>>, %arg2: memref<2xf32, #tpu.memory_space<smem>>) -> (i32, i32) {
    %c0_i32 = arith.constant 0 : i32
    %c0_i32_0 = arith.constant 0 : i32
    %c0_i32_1 = arith.constant 0 : i32
    return %c0_i32, %c0_i32_0 : i32, i32
  }
  func.func @transform_3(%arg0: i32, %arg1: memref<2xf32, #tpu.memory_space<smem>>, %arg2: memref<2xf32, #tpu.memory_space<smem>>) -> (i32, i32) {
    %c0_i32 = arith.constant 0 : i32
    %c0_i32_0 = arith.constant 0 : i32
    %c0_i32_1 = arith.constant 0 : i32
    return %c0_i32, %c0_i32_0 : i32, i32
  }
  func.func @transform_4(%arg0: i32, %arg1: memref<2xf32, #tpu.memory_space<smem>>, %arg2: memref<2xf32, #tpu.memory_space<smem>>) -> (i32, i32) {
    %c0_i32 = arith.constant 0 : i32
    %c0_i32_0 = arith.constant 0 : i32
    %c0_i32_1 = arith.constant 0 : i32
    return %c0_i32, %c0_i32_0 : i32, i32
  }
  func.func @transform_5(%arg0: i32, %arg1: memref<2xf32, #tpu.memory_space<smem>>, %arg2: memref<2xf32, #tpu.memory_space<smem>>) -> (i32, i32) {
    %c0_i32 = arith.constant 0 : i32
    %c0_i32_0 = arith.constant 0 : i32
    %c0_i32_1 = arith.constant 0 : i32
    return %c0_i32, %c0_i32_0 : i32, i32
  }
  func.func @transform_6(%arg0: i32, %arg1: memref<2xf32, #tpu.memory_space<smem>>, %arg2: memref<2xf32, #tpu.memory_space<smem>>) -> (i32, i32) {
    %c0_i32 = arith.constant 0 : i32
    %c0_i32_0 = arith.constant 0 : i32
    %c0_i32_1 = arith.constant 0 : i32
    return %c0_i32, %c0_i32_0 : i32, i32
  }
  func.func @transform_7(%arg0: i32, %arg1: memref<2xf32, #tpu.memory_space<smem>>, %arg2: memref<2xf32, #tpu.memory_space<smem>>) -> (i32, i32) {
    %c0_i32 = arith.constant 0 : i32
    %c0_i32_0 = arith.constant 0 : i32
    %c0_i32_1 = arith.constant 0 : i32
    return %c0_i32, %c0_i32_0 : i32, i32
  }
}

</mosaic_0001>

<bundles_post_ra>
// kernel: tpu_custom_call.1
= control target key start
LH: loop header
LB: loop body
LE: loop exit
PB: predicated region body
PF: predicated region fallthrough
CT: control target
= control target key end

     0   :  { %s1462_s0 = inlined_call_operand.vmem [shape: f32[2], index: 0, kind: input, shape index: {}]   ;;  %s1463_s2 = inlined_call_operand.vmem [shape: f32[2,64,64], index: 2, kind: input, shape index: {}]   ;;  %s1464_s3 = inlined_call_operand.hbm [shape: f32[2,64,64], index: 3, kind: input, shape index: {}]   ;;  %s1465_s4 = inlined_call_operand.vmem [shape: f32[64,32], index: 4, kind: input, shape index: {}]   ;;  %s1466_s5 = inlined_call_operand.vmem [shape: f32[32,64], index: 5, kind: input, shape index: {}]   ;;  %s1467_s6 = inlined_call_operand.vmem [shape: f32[1,64], index: 6, kind: input, shape index: {}]   ;;  %s1468_s7 = inlined_call_operand.vmem [shape: f32[64,32], index: 7, kind: input, shape index: {}]   ;;  %s1469_s8 = inlined_call_operand.vmem [shape: f32[1,32], index: 8, kind: input, shape index: {}]   ;;  %s1470_s9 = inlined_call_operand.vmem [shape: f32[64,32], index: 9, kind: output, shape index: {}]   ;;  %s1471_s1 = inlined_call_operand.vmem [shape: f32[2], index: 1, kind: input, shape index: {}]  }
   0x1   :  { %s14_s11 = sshll.u32 %s1462_s0, 4  ;;  %s18_s14 = sshll.u32 %s1471_s1, 4  ;;  %s15_s11 = int_to_ptr.vmem [resolvable:$true] %s14_s11  ;;  %s19_s14 = int_to_ptr.vmem [resolvable:$true] %s18_s14 }
   0x2   :  { %s1112_s15 = scalar_lea.vmem %s15_s11, 16  ;;  %p1117_p1 = scmp.lt.s32.totalorder %s15_s11, %s15_s11 }
   0x3   :  { %p1113_p0 = scmp.ne.s32.totalorder %s15_s11, %s1112_s15  ;;  %p1118_p2 = scmp.lt.s32.totalorder %s1112_s15, %s1112_s15 }
   0x5   :  { %p1119_p3 = por %p1118_p2, %p1117_p1 }
   0x7   :  { %p1120_p4 = pnand %p1119_p3, %p1113_p0 }
   0x9   :  { %1123 = shalt.err (!%p1120_p4)  }
   0xa   :  { %s1162_s16 = smov [#allocation3]   ;;  %s1124_s17 = scalar_lea.vmem %s19_s14, 16 }
   0xb   :  { %17 = dma.vmem_to_smem %s15_s11, 16, %s1162_s16, [#allocation2] }
   0xc   :  { %p1125_p5 = scmp.ne.s32.totalorder %s19_s14, %s1124_s17  ;;  %p1129_p6 = scmp.lt.s32.totalorder %s19_s14, %s19_s14 }
   0xd   :  { %p1130_p7 = scmp.lt.s32.totalorder %s1124_s17, %s1124_s17 }
   0xf   :  { %p1131_p8 = por %p1130_p7, %p1129_p6 }
  0x11   :  { %p1132_p9 = pnand %p1131_p8, %p1125_p5 }
  0x13   :  { %1135 = shalt.err (!%p1132_p9)  }
  0x14   :  { %s1163_s0 = smov [#allocation4]  }
  0x15   :  { %21 = dma.vmem_to_smem %s19_s14, 16, %s1163_s0, [#allocation2] }
  0x16   :  { %1158 = dma.done.wait [#allocation2], 32 }
  0x17   :  { %1159 = vsyncadd [#allocation2], 4294967264 }
  0x18   :  { %23 = sfence }
  0x19   :  { %24 = vsyncpa [#allocation6], 0  ;;  %s1164_s1 = smov [#allocation5]   ;;  %s1136_s21 = scalar_lea.hbm %s1464_s3, 2048 }
  0x1a   :  { %s32_s18 = sshll.u32 %s1164_s1, 4  ;;  %p1137_p10 = scmp.ne.s32.totalorder %s1464_s3, %s1136_s21  ;;  %s33_s18 = int_to_ptr.vmem [resolvable:$true] %s32_s18 }
  0x1b   :  { %p1140_p11 = scmp.lt.u32.totalorder %s1136_s21, %s1464_s3 }
  0x1d   :  { %p1142_p12 = pnand %p1140_p11, %p1137_p10 }
  0x1f   :  { %1145 = shalt.err (!%p1142_p12)
}
  0x20   :  { %s1146_s26 = scalar_lea.vmem %s33_s18, 2048  ;;  %p1151_p0 = scmp.lt.s32.totalorder %s33_s18, %s33_s18 }
  0x21   :  { %p1147_p13 = scmp.ne.s32.totalorder %s33_s18, %s1146_s26  ;;  %p1152_p1 = scmp.lt.s32.totalorder %s1146_s26, %s1146_s26 }
  0x23   :  { %p1153_p2 = por %p1152_p1, %p1151_p0 }
  0x25   :  { %p1154_p3 = pnand %p1153_p2, %p1147_p13 }
  0x27   :  { %1157 = shalt.err (!%p1154_p3)
}
  0x28   :  { %s1165_s27 = smov 128   ;;  %s1166_s28 = smov 8  }
  0x29   :  { %38 = dma.hbm_to_vmem [thread:$0]  %s1464_s3, 2048, %s33_s18, [#allocation6], %s1165_s27, %s1165_s27, %s1166_s28  }
  0x2a   :  { %1160 = dma.done.wait [#allocation6], 2048  }
  0x2b   :  { %1161 = vsyncadd [#allocation6], 4294965248  ;;  %s52_s10 = sld [smem:[#allocation3]]  ;;  %s819_s11 = sld [smem:[#allocation3 + $0x1]]  ;;  %v167_v0 = vld [vmem:[%s1465_s4] sm:$0xff]  ;;  %v168_v1 = vld [vmem:[%s1465_s4 + $0x8] sm:$0xff] }
  0x2c   :  { %v169_v2 = vld [vmem:[%s1465_s4 + $0x10] sm:$0xff]  ;;  %v1027_v4 = vpack.c.bf16 %v168_v1, %v167_v0  ;;  %v170_v5 = vld [vmem:[%s1465_s4 + $0x18] sm:$0xff]  ;;  %v171_v8 = vld [vmem:[%s1465_s4 + $0x20] sm:$0xff]  ;;  %vm142_vm0 = vcmask 523264   ;;  %vm323_vm1 = vcmask 261120  }
  0x2d   :  { %v1031_v7 = vpack.c.bf16 %v170_v5, %v169_v2  ;;  %v172_v9 = vld [vmem:[%s1465_s4 + $0x28] sm:$0xff]  ;;  %v53_v10 = vld [vmem:[%s1463_s2] sm:$0xff]  ;;  %v173_v15 = vld [vmem:[%s1465_s4 + $0x30] sm:$0xff] }
  0x2e   :  { %1028 = vmatprep.subr.bf16.mxu0 %v1027_v4  ;;  %v820_v12 = vld [vmem:[%s1463_s2 + $0x40] sm:$0xff]  ;;  %v1035_v14 = vpack.c.bf16 %v172_v9, %v171_v8  ;;  %v174_v16 = vld [vmem:[%s1465_s4 + $0x38] sm:$0xff]  ;;  %v54_v18 = vld [vmem:[%s1463_s2 + $0x8] sm:$0xff] }
  0x2f   :  { %1030 = vmatpush3.bf16.msra.mxu0 %v1027_v4  ;;  %v821_v19 = vld [vmem:[%s1463_s2 + $0x48] sm:$0xff]  ;;  %v175_v20 = vld [vmem:[%s1466_s5] sm:$0xff]  ;;  %v177_v22 = vld [vmem:[%s1466_s5 + $0x10] sm:$0xff]  ;;  %v1039_v23 = vpack.c.bf16 %v174_v16, %v173_v15 }
  0x30   :  { %1032 = vmatprep.subr.bf16.mxu0 %v1031_v7  ;;  %v176_v21 = vld [vmem:[%s1466_s5 + $0x8] sm:$0xff]  ;;  %v55_v24 = vld [vmem:[%s1463_s2 + $0x10] sm:$0xff]  ;;  %v178_v26 = vld [vmem:[%s1466_s5 + $0x18] sm:$0xff] }
  0x31   :  { %v1244_v3 = vstv %s52_s10  ;;  %v1249_v6 = vstv %s819_s11  ;;  %v822_v25 = vld [vmem:[%s1463_s2 + $0x50] sm:$0xff]  ;;  %v1043_v27 = vpack.c.bf16 %v176_v21, %v175_v20  ;;  %v1047_v28 = vpack.c.bf16 %v178_v26, %v177_v22  ;;  %v56_v33 = vld [vmem:[%s1463_s2 + $0x18] sm:$0xff] }
  0x32   :  { %v62_v11 = vmul.f32 %v1244_v3, %v53_v10  ;;  %v81_v13 = vmul.f32 %v820_v12, %v1249_v6  ;;  %v63_v29 = vmul.f32 %v1244_v3, %v54_v18  ;;  %v82_v30 = vmul.f32 %v821_v19, %v1249_v6  ;;  %v823_v34 = vld [vmem:[%s1463_s2 + $0x58] sm:$0xff]  ;;  %v57_v35 = vld [vmem:[%s1463_s2 + $0x20] sm:$0xff]  ;;  %v58_v43 = vld [vmem:[%s1463_s2 + $0x28] sm:$0xff] }
  0x33   :  { %1034 = vmatpush3.bf16.msra.mxu0 %v1031_v7  ;;  %v64_v31 = vmul.f32 %v1244_v3, %v55_v24  ;;  %v83_v32 = vmul.f32 %v822_v25, %v1249_v6  ;;  %1044 = vmatprep.subr.bf16.mxu1 %v1043_v27  ;;  %v824_v36 = vld [vmem:[%s1463_s2 + $0x60] sm:$0xff]  ;;  %v65_v38 = vmul.f32 %v1244_v3, %v56_v33  ;;  %v825_v44 = vld [vmem:[%s1463_s2 + $0x68] sm:$0xff]  ;;  %v59_v45 = vld [vmem:[%s1463_s2 + $0x30] sm:$0xff] }
  0x34   :  { %v89_v17 = vadd.f32 %v81_v13, %v62_v11  ;;  %1036 = vmatprep.subr.bf16.mxu0 %v1035_v14  ;;  %1046 = vmatpush3.bf16.msra.mxu1 %v1043_v27  ;;  %v90_v37 = vadd.f32 %v82_v30, %v63_v29  ;;  %v84_v39 = vmul.f32 %v823_v34, %v1249_v6  ;;  %v826_v46 = vld [vmem:[%s1463_s2 + $0x70] sm:$0xff]  ;;  %v60_v53 = vld [vmem:[%s1463_s2 + $0x38] sm:$0xff]  ;;  %v477_v62 = vld [vmem:[%s1468_s7] sm:$0xff] }
  0x35   :  { %1048 = vmatprep.subr.bf16.mxu1 %v1047_v28  ;;  %v91_v40 = vadd.f32 %v83_v32, %v64_v31  ;;  %v66_v41 = vmul.f32 %v1244_v3, %v57_v35  ;;  %v85_v42 = vmul.f32 %v824_v36, %v1249_v6  ;;  %v67_v48 = vmul.f32 %v1244_v3, %v58_v43  ;;  %v827_v54 = vld [vmem:[%s1463_s2 + $0x78] sm:$0xff]  ;;  %v478_v63 = vld [vmem:[%s1468_s7 + $0x8] sm:$0xff]  ;;  %v479_v7 = vld [vmem:[%s1468_s7 + $0x10] sm:$0xff] }
  0x36   :  { %939 = vmatprep.mubr.msk.f32.mxu0 %vm142_vm0, %v89_v17  ;;  %v92_v47 = vadd.f32 %v84_v39, %v65_v38  ;;  %v86_v49 = vmul.f32 %v825_v44, %v1249_v6  ;;  %v68_v51 = vmul.f32 %v1244_v3, %v59_v45  ;;  %v87_v52 = vmul.f32 %v826_v46, %v1249_v6  ;;  %v480_v8 = vld [vmem:[%s1468_s7 + $0x18] sm:$0xff]  ;;  %v481_v18 = vld [vmem:[%s1468_s7 + $0x20] sm:$0xff]  ;;  %v482_v19 = vld [vmem:[%s1468_s7 + $0x28] sm:$0xff] }
  0x37   :  { %1038 = vmatpush3.bf16.msra.mxu0 %v1035_v14  ;;  %v93_v50 = vadd.f32 %v85_v42, %v66_v41  ;;  %v69_v56 = vmul.f32 %v1244_v3, %v60_v53  ;;  %v88_v57 = vmul.f32 %v827_v54, %v1249_v6  ;;  %v143_v60 = vsel %vm142_vm0, %v89_v17, 0.0  ;;  %v483_v21 = vld [vmem:[%s1468_s7 + $0x30] sm:$0xff]  ;;  %v484_v22 = vld [vmem:[%s1468_s7 + $0x38] sm:$0xff]  ;;  %s828_s7 = sld [smem:[#allocation4 + $0x1]] }
  0x38   :  { %1040 = vmatprep.subr.bf16.mxu0 %v1039_v23  ;;  %1050 = vmatpush3.bf16.msra.mxu1 %v1047_v28  ;;  %v94_v55 = vadd.f32 %v86_v49, %v67_v48  ;;  %v95_v58 = vadd.f32 %v87_v52, %v68_v51  ;;  %v149_v61 = vsel %vm142_vm0, %v91_v40, 0.0  ;;  %v146_v0 = vsel %vm142_vm0, %v90_v37, 0.0  ;;  %v837_v28 = vld [vmem:[%s1467_s6] ss:$0 sm:$0xff]  ;;  %s97_s6 = sld [smem:[#allocation4]] }
  0x39   :  { %v96_v59 = vadd.f32 %v88_v57, %v69_v56  ;;  %144 = vadd.xlane.f32.xlu0 %v143_v60  ;;  %150 = vadd.xlane.f32.xlu1 %v149_v61  ;;  %v152_v1 = vsel %vm142_vm0, %v92_v47, 0.0  ;;  %v1051_v2 = vpack.c.bf16 %v478_v63, %v477_v62  ;;  %v155_v4 = vsel %vm142_vm0, %v93_v50, 0.0 }
  0x3a   :  { %v158_v3 = vsel %vm142_vm0, %v94_v55, 0.0  ;;  %v161_v6 = vsel %vm142_vm0, %v95_v58, 0.0  ;;  %v1055_v11 = vpack.c.bf16 %v480_v8, %v479_v7  ;;  %v1059_v20 = vpack.c.bf16 %v482_v19, %v481_v18 }
  0x3b   :  { %1042 = vmatpush3.bf16.msra.mxu0 %v1039_v23  ;;  %1052 = vmatprep.subr.bf16.mxu1 %v1051_v2  ;;  %v164_v5 = vsel %vm142_vm0, %v96_v59, 0.0  ;;  %v1063_v23 = vpack.c.bf16 %v484_v22, %v483_v21  ;;  %v100_v21 = vld [vmem:[#allocation5 + $0x10] sm:$0xff] }
  0x3c   :  { %v119_v22 = vld [vmem:[#allocation5 + $0x50] sm:$0xff] }
  0x3d   :  { %147 = vadd.xlane.f32.xlu0 %v146_v0  ;;  %153 = vadd.xlane.f32.xlu1 %v152_v1 }
  0x3e   :  { %940 = vmatmul.mubr.msk.f32.vlgmr.msra.gmra.mrb[0].mxu0 %vm142_vm0, %v90_v37 }
  0x3f   :  { %942 = vmatprep.mubr.msk.f32.mxu0 %vm142_vm0, %v91_v40 }
  0x41   :  { %159 = vadd.xlane.f32.xlu1 %v158_v3  ;;  %156 = vadd.xlane.f32.xlu0 %v155_v4 }
  0x42   :  { %943 = vmatmul.mubr.msk.f32.gmra.mrb[2].mxu0 %vm142_vm0, %v92_v47 }
  0x43   :  { %945 = vmatprep.mubr.msk.f32.mxu0 %vm142_vm0, %v93_v50 }
  0x45   :  { %165 = vadd.xlane.f32.xlu1 %v164_v5  ;;  %162 = vadd.xlane.f32.xlu0 %v161_v6 }
  0x46   :  { %946 = vmatmul.mubr.msk.f32.gmra.mrb[4].mxu0 %vm142_vm0, %v94_v55 }
  0x47   :  { %948 = vmatprep.mubr.msk.f32.mxu0 %vm142_vm0, %v95_v58 }
  0x4a   :  { %949 = vmatmul.mubr.msk.f32.gmra.mrb[6].mxu0 %vm142_vm0, %v96_v59 }
  0xc6   :  { %v145_v24 = vpop.xlane.xlu0 %144  ;;  %v151_v25 = vpop.xlane.xlu1 %150 }
  0xc7   :  { %v315_v30 = vmul.f32 %v837_v28, %v145_v24  ;;  %v317_v39 = vmul.f32 %v837_v28, %v151_v25  ;;  %v101_v25 = vld [vmem:[#allocation5 + $0x18] sm:$0xff] }
  0xca   :  { %v148_v26 = vpop.xlane.xlu0 %147  ;;  %v154_v27 = vpop.xlane.xlu1 %153 }
  0xcb   :  { %v316_v29 = vmul.f32 %v837_v28, %v148_v26  ;;  %v318_v35 = vmul.f32 %v837_v28, %v154_v27  ;;  %v120_v26 = vld [vmem:[#allocation5 + $0x58] sm:$0xff] }
  0xce   :  { %v160_v32 = vpop.xlane.xlu1 %159  ;;  %v157_v36 = vpop.xlane.xlu0 %156 }
  0xcf   :  { %v320_v44 = vmul.f32 %v837_v28, %v160_v32  ;;  %v319_v47 = vmul.f32 %v837_v28, %v157_v36  ;;  %v121_v32 = vld [vmem:[#allocation5 + $0x60] sm:$0xff]  ;;  %v122_v36 = vld [vmem:[#allocation5 + $0x68] sm:$0xff] }
  0xd2   :  { %v166_v48 = vpop.xlane.xlu1 %165  ;;  %v163_v51 = vpop.xlane.xlu0 %162 }
  0xd3   :  { %v322_v56 = vmul.f32 %v837_v28, %v166_v48  ;;  %v321_v59 = vmul.f32 %v837_v28, %v163_v51  ;;  %v846_v51 = vld [vmem:[%s1469_s8] ss:$0 sm:$0xff] }
 0x111   :  { %v941_v9 = vpop.f32.mrb[0].mxu0 }
 0x112   :  { %v270_v10 = vpop.f32.mrb[1].mxu0 }
 0x113   :  { %959 = vmatprep.mubr.msk.f32.mxu1 %vm323_vm1, %v270_v10  ;;  %v106_v10 = vstv %s97_s6 }
 0x114   :  { %960 = vmatmul.mubr.msk.f32.vlgmr.msra.gmra.mrb[0].mxu1 %vm323_vm1, %v941_v9  ;;  %v98_v9 = vld [vmem:[#allocation5] sm:$0xff]  ;;  %v110_v27 = vmul.f32 %v106_v10, %v101_v25 }
 0x115   :  { %v944_v12 = vpop.f32.mrb[2].mxu0  ;;  %1054 = vmatpush3.bf16.msra.mxu1 %v1051_v2 }
 0x116   :  { %v280_v13 = vpop.f32.mrb[3].mxu0  ;;  %1056 = vmatprep.subr.bf16.mxu1 %v1055_v11 }
 0x117   :  { %962 = vmatprep.mubr.msk.f32.mxu1 %vm323_vm1, %v280_v13  ;;  %v107_v13 = vmul.f32 %v106_v10, %v98_v9 }
 0x118   :  { %963 = vmatmul.mubr.msk.f32.gmra.mrb[2].mxu1 %vm323_vm1, %v944_v12  ;;  %v125_v12 = vstv %s828_s7 }
 0x119   :  { %v947_v14 = vpop.f32.mrb[4].mxu0  ;;  %1058 = vmatpush3.bf16.msra.mxu1 %v1055_v11  ;;  %v117_v11 = vld [vmem:[#allocation5 + $0x40] sm:$0xff]  ;;  %v128_v24 = vmul.f32 %v125_v12, %v119_v22  ;;  %v129_v28 = vmul.f32 %v125_v12, %v120_v26 }
 0x11a   :  { %v290_v15 = vpop.f32.mrb[5].mxu0  ;;  %1060 = vmatprep.subr.bf16.mxu1 %v1059_v20 }
 0x11b   :  { %965 = vmatprep.mubr.msk.f32.mxu1 %vm323_vm1, %v290_v15  ;;  %v99_v15 = vld [vmem:[#allocation5 + $0x8] sm:$0xff] }
 0x11c   :  { %966 = vmatmul.mubr.msk.f32.gmra.mrb[4].mxu1 %vm323_vm1, %v947_v14  ;;  %v126_v14 = vmul.f32 %v125_v12, %v117_v11 }
 0x11d   :  { %v950_v16 = vpop.f32.mrb[6].mxu0  ;;  %1062 = vmatpush3.bf16.msra.mxu1 %v1059_v20 }
 0x11e   :  { %v300_v17 = vpop.f32.mrb[7].mxu0  ;;  %1064 = vmatprep.subr.bf16.mxu1 %v1063_v23  ;;  %v134_v19 = vadd.f32 %v126_v14, %v107_v13 }
 0x11f   :  { %968 = vmatprep.mubr.msk.f32.mxu1 %vm323_vm1, %v300_v17  ;;  %v108_v17 = vmul.f32 %v106_v10, %v99_v15 }
 0x120   :  { %969 = vmatmul.mubr.msk.f32.gmra.mrb[6].mxu1 %vm323_vm1, %v950_v16  ;;  %v118_v16 = vld [vmem:[#allocation5 + $0x48] sm:$0xff]  ;;  %1015 = vmatprep.mubr.msk.f32.mxu0 %vm142_vm0, %v134_v19 }
 0x121   :  { %1066 = vmatpush3.bf16.msra.mxu1 %v1063_v23  ;;  %v127_v18 = vmul.f32 %v125_v12, %v118_v16  ;;  %v109_v23 = vmul.f32 %v106_v10, %v100_v21 }
 0x123   :  { %v1398_v20 = vadd.f32 %v127_v18, %v108_v17 }
 0x1e7   :  { %v961_v31 = vpop.f32.mrb[0].mxu1 }
 0x1e8   :  { %v420_v33 = vadd.f32 %v961_v31, %v316_v29  ;;  %v414_v34 = vpop.f32.mrb[1].mxu1  ;;  %v136_v29 = vadd.f32 %v128_v24, %v109_v23  ;;  %v102_v31 = vld [vmem:[#allocation5 + $0x20] sm:$0xff] }
 0x1e9   :  { %v415_v37 = vadd.f32 %v414_v34, %v315_v30  ;;  %v137_v30 = vadd.f32 %v129_v28, %v110_v27  ;;  %v130_v34 = vmul.f32 %v125_v12, %v121_v32 }
 0x1ea   :  { %v462_v38 = vmul.f32 0.2, %v420_v33  ;;  %vm454_vm2 = vcmp.ge.f32.partialorder %v420_v33, 0.0 }
 0x1eb   :  { %vm453_vm3 = vcmp.ge.f32.partialorder %v415_v37, 0.0  ;;  %v461_v40 = vmul.f32 0.2, %v415_v37  ;;  %v964_v41 = vpop.f32.mrb[2].mxu1 }
 0x1ec   :  { %v430_v42 = vadd.f32 %v964_v41, %v318_v35  ;;  %v424_v43 = vpop.f32.mrb[3].mxu1  ;;  %v470_v49 = vsel %vm454_vm2, %v420_v33, %v462_v38  ;;  %v111_v33 = vmul.f32 %v106_v10, %v102_v31  ;;  %v103_v35 = vld [vmem:[#allocation5 + $0x28] sm:$0xff]  ;;  %v131_v38 = vmul.f32 %v125_v12, %v122_v36  ;;  %v123_v41 = vld [vmem:[#allocation5 + $0x70] sm:$0xff] }
 0x1ed   :  { %v425_v45 = vadd.f32 %v424_v43, %v317_v39  ;;  %v469_v46 = vsel %vm453_vm3, %v415_v37, %v461_v40  ;;  %v112_v37 = vmul.f32 %v106_v10, %v103_v35  ;;  %v104_v40 = vld [vmem:[#allocation5 + $0x30] sm:$0xff] }
 0x1ee   :  { %v464_v50 = vmul.f32 0.2, %v430_v42  ;;  %987 = vmatprep.mubr.msk.f32.mxu1 %vm142_vm0, %v469_v46  ;;  %vm456_vm4 = vcmp.ge.f32.partialorder %v430_v42, 0.0  ;;  %v138_v39 = vadd.f32 %v130_v34, %v111_v33  ;;  %v113_v43 = vmul.f32 %v106_v10, %v104_v40  ;;  %v124_v46 = vld [vmem:[#allocation5 + $0x78] sm:$0xff] }
 0x1ef   :  { %vm455_vm5 = vcmp.ge.f32.partialorder %v425_v45, 0.0  ;;  %v463_v52 = vmul.f32 0.2, %v425_v45  ;;  %v967_v53 = vpop.f32.mrb[4].mxu1  ;;  %988 = vmatmul.mubr.msk.f32.vlgmr.msra.gmra.mrb[8].mxu1 %vm142_vm0, %v470_v49  ;;  %v133_v48 = vmul.f32 %v125_v12, %v124_v46 }
 0x1f0   :  { %v440_v54 = vadd.f32 %v967_v53, %v320_v44  ;;  %v434_v55 = vpop.f32.mrb[5].mxu1  ;;  %v472_v61 = vsel %vm456_vm4, %v430_v42, %v464_v50  ;;  %v139_v42 = vadd.f32 %v131_v38, %v112_v37  ;;  %v132_v44 = vmul.f32 %v125_v12, %v123_v41 }
 0x1f1   :  { %v435_v57 = vadd.f32 %v434_v55, %v319_v47  ;;  %v471_v58 = vsel %vm455_vm5, %v425_v45, %v463_v52  ;;  %v105_v45 = vld [vmem:[#allocation5 + $0x38] sm:$0xff] }
 0x1f2   :  { %v466_v60 = vmul.f32 0.2, %v440_v54  ;;  %990 = vmatprep.mubr.msk.f32.mxu1 %vm142_vm0, %v471_v58  ;;  %vm458_vm6 = vcmp.ge.f32.partialorder %v440_v54, 0.0  ;;  %v114_v47 = vmul.f32 %v106_v10, %v105_v45  ;;  %v140_v49 = vadd.f32 %v132_v44, %v113_v43 }
 0x1f3   :  { %vm457_vm7 = vcmp.ge.f32.partialorder %v435_v57, 0.0  ;;  %v465_v62 = vmul.f32 0.2, %v435_v57  ;;  %v970_v63 = vpop.f32.mrb[6].mxu1  ;;  %991 = vmatmul.mubr.msk.f32.gmra.mrb[10].mxu1 %vm142_vm0, %v472_v61 }
 0x1f4   :  { %v450_v0 = vadd.f32 %v970_v63, %v322_v56  ;;  %v444_v1 = vpop.f32.mrb[7].mxu1  ;;  %v474_v5 = vsel %vm458_vm6, %v440_v54, %v466_v60  ;;  %v141_v50 = vadd.f32 %v133_v48, %v114_v47 }
 0x1f5   :  { %v445_v2 = vadd.f32 %v444_v1, %v321_v59  ;;  %v473_v3 = vsel %vm457_vm7, %v435_v57, %v465_v62 }
 0x1f6   :  { %v468_v4 = vmul.f32 0.2, %v450_v0  ;;  %993 = vmatprep.mubr.msk.f32.mxu1 %vm142_vm0, %v473_v3  ;;  %vm460_vm8 = vcmp.ge.f32.partialorder %v450_v0, 0.0 }
 0x1f7   :  { %vm459_vm9 = vcmp.ge.f32.partialorder %v445_v2, 0.0  ;;  %v467_v6 = vmul.f32 0.2, %v445_v2  ;;  %994 = vmatmul.mubr.msk.f32.gmra.mrb[12].mxu1 %vm142_vm0, %v474_v5 }
 0x1f8   :  { %v476_v8 = vsel %vm460_vm8, %v450_v0, %v468_v4 }
 0x1f9   :  { %v475_v7 = vsel %vm459_vm9, %v445_v2, %v467_v6 }
 0x1fa   :  { %996 = vmatprep.mubr.msk.f32.mxu1 %vm142_vm0, %v475_v7 }
 0x1fb   :  { %997 = vmatmul.mubr.msk.f32.gmra.mrb[14].mxu1 %vm142_vm0, %v476_v8 }
 0x1fc   :  { %1024 = vmatprep.mubr.msk.f32.mxu1 %vm142_vm0, %v140_v49 }
 0x2c2   :  { %v989_v52 = vpop.f32.mrb[8].mxu1 }
 0x2c3   :  { %v588_v53 = vadd.f32 %v989_v52, %v846_v51  ;;  %v582_v54 = vpop.f32.mrb[9].mxu1 }
 0x2c4   :  { %v583_v55 = vadd.f32 %v846_v51, %v582_v54 }
 0x2c6   :  { %v1067_v56 = vpack.c.bf16 %v588_v53, %v583_v55  ;;  %v992_v57 = vpop.f32.mrb[10].mxu1 }
 0x2c7   :  { %v598_v58 = vadd.f32 %v992_v57, %v846_v51  ;;  %v592_v59 = vpop.f32.mrb[11].mxu1 }
 0x2c8   :  { %v593_v60 = vadd.f32 %v846_v51, %v592_v59  ;;  %1068 = vmatprep.subr.bf16.mxu0 %v1067_v56  ;;  %1083 = vmatprep.subr.bf16.mxu1 %v1067_v56 }
 0x2c9   :  { %1070 = vmatpush3.bf16.msra.mxu0 %v1067_v56  ;;  %1087 = vmatpush3.bf16.msra.mxu1 %v1067_v56 }
 0x2ca   :  { %v1071_v61 = vpack.c.bf16 %v598_v58, %v593_v60  ;;  %v995_v62 = vpop.f32.mrb[12].mxu1 }
 0x2cb   :  { %v608_v63 = vadd.f32 %v995_v62, %v846_v51  ;;  %v602_v0 = vpop.f32.mrb[13].mxu1 }
 0x2cc   :  { %v603_v1 = vadd.f32 %v846_v51, %v602_v0  ;;  %1072 = vmatprep.subr.bf16.mxu0 %v1071_v61  ;;  %1084 = vmatprep.subr.bf16.mxu1 %v1071_v61 }
 0x2cd   :  { %1074 = vmatpush3.bf16.msra.mxu0 %v1071_v61  ;;  %1088 = vmatpush3.bf16.msra.mxu1 %v1071_v61 }
 0x2ce   :  { %v1075_v2 = vpack.c.bf16 %v608_v63, %v603_v1  ;;  %v998_v3 = vpop.f32.mrb[14].mxu1 }
 0x2cf   :  { %v618_v4 = vadd.f32 %v998_v3, %v846_v51  ;;  %v612_v5 = vpop.f32.mrb[15].mxu1 }
 0x2d0   :  { %v613_v6 = vadd.f32 %v846_v51, %v612_v5  ;;  %1076 = vmatprep.subr.bf16.mxu0 %v1075_v2  ;;  %1085 = vmatprep.subr.bf16.mxu1 %v1075_v2 }
 0x2d1   :  { %1078 = vmatpush3.bf16.msra.mxu0 %v1075_v2  ;;  %1089 = vmatpush3.bf16.msra.mxu1 %v1075_v2 }
 0x2d2   :  { %v1079_v7 = vpack.c.bf16 %v618_v4, %v613_v6 }
 0x2d4   :  { %1080 = vmatprep.subr.bf16.mxu0 %v1079_v7  ;;  %1086 = vmatprep.subr.bf16.mxu1 %v1079_v7 }
 0x2d5   :  { %1082 = vmatpush3.bf16.msra.mxu0 %v1079_v7  ;;  %1090 = vmatpush3.bf16.msra.mxu1 %v1079_v7 }
 0x2d8   :  { %1016 = vmatmul.mubr.msk.f32.vlgmr.msra.gmra.mrb[8].mxu0 %vm142_vm0, %v1398_v20  ;;  %1025 = vmatmul.mubr.msk.f32.vlgmr.msra.gmra.mrb[16].mxu1 %vm142_vm0, %v141_v50 }
 0x2d9   :  { %1018 = vmatprep.mubr.msk.f32.mxu0 %vm142_vm0, %v136_v29 }
 0x2dc   :  { %1019 = vmatmul.mubr.msk.f32.gmra.mrb[10].mxu0 %vm142_vm0, %v137_v30 }
 0x2dd   :  { %1021 = vmatprep.mubr.msk.f32.mxu0 %vm142_vm0, %v138_v39 }
 0x2e0   :  { %1022 = vmatmul.mubr.msk.f32.gmra.mrb[12].mxu0 %vm142_vm0, %v139_v42 }
 0x3ab   :  { %v1017_v8 = vpop.f32.mrb[8].mxu0  ;;  %v1412_v9 = vpop.f32.mrb[16].mxu1 }
 0x3ac   :  { %v751_v10 = vmul.f32 %v1017_v8, %v1017_v8  ;;  %v711_v11 = vpop.f32.mrb[9].mxu0  ;;  %v1414_v12 = vpop.f32.mrb[17].mxu1  ;;  %v757_v25 = vmul.f32 %v1412_v9, %v1412_v9 }
 0x3ad   :  { %v750_v13 = vmul.f32 %v711_v11, %v711_v11  ;;  %v756_v27 = vmul.f32 %v1414_v12, %v1414_v12 }
 0x3ae   :  { %v761_v14 = vsel %vm323_vm1, %v751_v10, 0.0  ;;  %v779_v30 = vsel %vm323_vm1, %v757_v25, 0.0 }
 0x3af   :  { %762 = vadd.xlane.f32.xlu1 %v761_v14  ;;  %v1020_v15 = vpop.f32.mrb[10].mxu0  ;;  %v758_v16 = vsel %vm323_vm1, %v750_v13, 0.0  ;;  %v776_v31 = vsel %vm323_vm1, %v756_v27, 0.0 }
 0x3b0   :  { %v753_v17 = vmul.f32 %v1020_v15, %v1020_v15  ;;  %759 = vadd.xlane.f32.xlu0 %v758_v16  ;;  %v721_v18 = vpop.f32.mrb[11].mxu0 }
 0x3b1   :  { %v752_v19 = vmul.f32 %v721_v18, %v721_v18 }
 0x3b2   :  { %v767_v20 = vsel %vm323_vm1, %v753_v17, 0.0 }
 0x3b3   :  { %768 = vadd.xlane.f32.xlu1 %v767_v20  ;;  %v1023_v21 = vpop.f32.mrb[12].mxu0  ;;  %v764_v22 = vsel %vm323_vm1, %v752_v19, 0.0 }
 0x3b4   :  { %v755_v23 = vmul.f32 %v1023_v21, %v1023_v21  ;;  %765 = vadd.xlane.f32.xlu0 %v764_v22  ;;  %v731_v24 = vpop.f32.mrb[13].mxu0 }
 0x3b5   :  { %v754_v26 = vmul.f32 %v731_v24, %v731_v24 }
 0x3b6   :  { %v773_v28 = vsel %vm323_vm1, %v755_v23, 0.0 }
 0x3b7   :  { %774 = vadd.xlane.f32.xlu1 %v773_v28  ;;  %v770_v29 = vsel %vm323_vm1, %v754_v26, 0.0 }
 0x3b8   :  { %771 = vadd.xlane.f32.xlu0 %v770_v29 }
 0x3bb   :  { %780 = vadd.xlane.f32.xlu1 %v779_v30 }
 0x3bc   :  { %777 = vadd.xlane.f32.xlu0 %v776_v31 }
 0x43c   :  { %v763_v32 = vpop.xlane.xlu1 %762 }
 0x43d   :  { %v783_v33 = vmax.f32 %v763_v32, 1e-24  ;;  %v760_v34 = vpop.xlane.xlu0 %759 }
 0x43e   :  { %v782_v35 = vmax.f32 %v760_v34, 1e-24 }
 0x43f   :  { %1096 = vrsqrt.f32 %v783_v33 }
 0x440   :  { %1098 = vrsqrt.f32 %v782_v35  ;;  %v769_v36 = vpop.xlane.xlu1 %768 }
 0x441   :  { %v785_v37 = vmax.f32 %v769_v36, 1e-24  ;;  %v766_v38 = vpop.xlane.xlu0 %765 }
 0x442   :  { %v784_v39 = vmax.f32 %v766_v38, 1e-24 }
 0x443   :  { %1100 = vrsqrt.f32 %v785_v37 }
 0x444   :  { %1102 = vrsqrt.f32 %v784_v39  ;;  %v775_v40 = vpop.xlane.xlu1 %774 }
 0x445   :  { %v787_v41 = vmax.f32 %v775_v40, 1e-24  ;;  %v772_v42 = vpop.xlane.xlu0 %771 }
 0x446   :  { %v786_v43 = vmax.f32 %v772_v42, 1e-24 }
 0x447   :  { %1104 = vrsqrt.f32 %v787_v41 }
 0x448   :  { %1106 = vrsqrt.f32 %v786_v43  ;;  %v781_v44 = vpop.xlane.xlu1 %780 }
 0x449   :  { %v1097_v45 = vpop.eup %1096  ;;  %v789_v46 = vmax.f32 %v781_v44, 1e-24  ;;  %v778_v47 = vpop.xlane.xlu0 %777 }
 0x44a   :  { %v1099_v48 = vpop.eup %1098  ;;  %v799_v49 = vmul.f32 %v1097_v45, %v1017_v8  ;;  %v788_v50 = vmax.f32 %v778_v47, 1e-24 }
 0x44b   :  { %v798_v51 = vmul.f32 %v1099_v48, %v711_v11  ;;  %1108 = vrsqrt.f32 %v789_v46 }
 0x44c   :  { %807 = vst.msk [vmem:[%s1470_s9 + $0x8] sm:$0xff] %vm323_vm1, %v799_v49  ;;  %1110 = vrsqrt.f32 %v788_v50 }
 0x44d   :  { %v1101_v52 = vpop.eup %1100  ;;  %806 = vst.msk [vmem:[%s1470_s9] sm:$0xff] %vm323_vm1, %v798_v51 }
 0x44e   :  { %v1103_v53 = vpop.eup %1102  ;;  %v801_v54 = vmul.f32 %v1101_v52, %v1020_v15 }
 0x44f   :  { %v800_v55 = vmul.f32 %v1103_v53, %v721_v18 }
 0x450   :  { %809 = vst.msk [vmem:[%s1470_s9 + $0x18] sm:$0xff] %vm323_vm1, %v801_v54 }
 0x451   :  { %v1105_v56 = vpop.eup %1104  ;;  %808 = vst.msk [vmem:[%s1470_s9 + $0x10] sm:$0xff] %vm323_vm1, %v800_v55 }
 0x452   :  { %v1107_v57 = vpop.eup %1106  ;;  %v803_v58 = vmul.f32 %v1105_v56, %v1023_v21 }
 0x453   :  { %v802_v59 = vmul.f32 %v1107_v57, %v731_v24 }
 0x454   :  { %811 = vst.msk [vmem:[%s1470_s9 + $0x28] sm:$0xff] %vm323_vm1, %v803_v58 }
 0x455   :  { %v1109_v60 = vpop.eup %1108  ;;  %810 = vst.msk [vmem:[%s1470_s9 + $0x20] sm:$0xff] %vm323_vm1, %v802_v59 }
 0x456   :  { %v1111_v61 = vpop.eup %1110  ;;  %v805_v62 = vmul.f32 %v1109_v60, %v1412_v9 }
 0x457   :  { %v804_v63 = vmul.f32 %v1111_v61, %v1414_v12 }
 0x458   :  { %813 = vst.msk [vmem:[%s1470_s9 + $0x38] sm:$0xff] %vm323_vm1, %v805_v62 }
 0x459   :  { %812 = vst.msk [vmem:[%s1470_s9 + $0x30] sm:$0xff] %vm323_vm1, %v804_v63 }
 0x45a   :  { %818 = vsyncpa [#allocation6], 1 }

// kernel: tpu_custom_call.1
= control target key start
LH: loop header
LB: loop body
LE: loop exit
PB: predicated region body
PF: predicated region fallthrough
CT: control target
= control target key end

     0   :  { %s1462_s0 = inlined_call_operand.vmem [shape: f32[2], index: 0, kind: input, shape index: {}]   ;;  %s1463_s2 = inlined_call_operand.vmem [shape: f32[2,64,64], index: 2, kind: input, shape index: {}]   ;;  %s1464_s3 = inlined_call_operand.hbm [shape: f32[2,64,64], index: 3, kind: input, shape index: {}]   ;;  %s1465_s4 = inlined_call_operand.vmem [shape: f32[64,32], index: 4, kind: input, shape index: {}]   ;;  %s1466_s5 = inlined_call_operand.vmem [shape: f32[32,64], index: 5, kind: input, shape index: {}]   ;;  %s1467_s6 = inlined_call_operand.vmem [shape: f32[1,64], index: 6, kind: input, shape index: {}]   ;;  %s1468_s7 = inlined_call_operand.vmem [shape: f32[64,32], index: 7, kind: input, shape index: {}]   ;;  %s1469_s8 = inlined_call_operand.vmem [shape: f32[1,32], index: 8, kind: input, shape index: {}]   ;;  %s1470_s9 = inlined_call_operand.vmem [shape: f32[64,32], index: 9, kind: output, shape index: {}]   ;;  %s1471_s1 = inlined_call_operand.vmem [shape: f32[2], index: 1, kind: input, shape index: {}]  }
   0x1   :  { %s14_s11 = sshll.u32 %s1462_s0, 4  ;;  %s18_s14 = sshll.u32 %s1471_s1, 4  ;;  %s15_s11 = int_to_ptr.vmem [resolvable:$true] %s14_s11  ;;  %s19_s14 = int_to_ptr.vmem [resolvable:$true] %s18_s14 }
   0x2   :  { %s1112_s15 = scalar_lea.vmem %s15_s11, 16  ;;  %p1117_p1 = scmp.lt.s32.totalorder %s15_s11, %s15_s11 }
   0x3   :  { %p1113_p0 = scmp.ne.s32.totalorder %s15_s11, %s1112_s15  ;;  %p1118_p2 = scmp.lt.s32.totalorder %s1112_s15, %s1112_s15 }
   0x5   :  { %p1119_p3 = por %p1118_p2, %p1117_p1 }
   0x7   :  { %p1120_p4 = pnand %p1119_p3, %p1113_p0 }
   0x9   :  { %1123 = shalt.err (!%p1120_p4)  }
   0xa   :  { %s1162_s16 = smov [#allocation3]   ;;  %s1124_s17 = scalar_lea.vmem %s19_s14, 16 }
   0xb   :  { %17 = dma.vmem_to_smem %s15_s11, 16, %s1162_s16, [#allocation2] }
   0xc   :  { %p1125_p5 = scmp.ne.s32.totalorder %s19_s14, %s1124_s17  ;;  %p1129_p6 = scmp.lt.s32.totalorder %s19_s14, %s19_s14 }
   0xd   :  { %p1130_p7 = scmp.lt.s32.totalorder %s1124_s17, %s1124_s17 }
   0xf   :  { %p1131_p8 = por %p1130_p7, %p1129_p6 }
  0x11   :  { %p1132_p9 = pnand %p1131_p8, %p1125_p5 }
  0x13   :  { %1135 = shalt.err (!%p1132_p9)  }
  0x14   :  { %s1163_s0 = smov [#allocation4]  }
  0x15   :  { %21 = dma.vmem_to_smem %s19_s14, 16, %s1163_s0, [#allocation2] }
  0x16   :  { %1158 = dma.done.wait [#allocation2], 32 }
  0x17   :  { %1159 = vsyncadd [#allocation2], 4294967264 }
  0x18   :  { %23 = sfence }
  0x19   :  { %24 = vsyncpa [#allocation6], 0  ;;  %s1164_s1 = smov [#allocation5]   ;;  %s1136_s21 = scalar_lea.hbm %s1464_s3, 2048 }
  0x1a   :  { %s32_s18 = sshll.u32 %s1164_s1, 4  ;;  %p1137_p10 = scmp.ne.s32.totalorder %s1464_s3, %s1136_s21  ;;  %s33_s18 = int_to_ptr.vmem [resolvable:$true] %s32_s18 }
  0x1b   :  { %p1140_p11 = scmp.lt.u32.totalorder %s1136_s21, %s1464_s3 }
  0x1d   :  { %p1142_p12 = pnand %p1140_p11, %p1137_p10 }
  0x1f   :  { %1145 = shalt.err (!%p1142_p12)
}
  0x20   :  { %s1146_s26 = scalar_lea.vmem %s33_s18, 2048  ;;  %p1151_p0 = scmp.lt.s32.totalorder %s33_s18, %s33_s18 }
  0x21   :  { %p1147_p13 = scmp.ne.s32.totalorder %s33_s18, %s1146_s26  ;;  %p1152_p1 = scmp.lt.s32.totalorder %s1146_s26, %s1146_s26 }
  0x23   :  { %p1153_p2 = por %p1152_p1, %p1151_p0 }
  0x25   :  { %p1154_p3 = pnand %p1153_p2, %p1147_p13 }
  0x27   :  { %1157 = shalt.err (!%p1154_p3)
}
  0x28   :  { %s1165_s27 = smov 128   ;;  %s1166_s28 = smov 8  }
  0x29   :  { %38 = dma.hbm_to_vmem [thread:$0]  %s1464_s3, 2048, %s33_s18, [#allocation6], %s1165_s27, %s1165_s27, %s1166_s28  }
  0x2a   :  { %1160 = dma.done.wait [#allocation6], 2048  }
  0x2b   :  { %1161 = vsyncadd [#allocation6], 4294965248  ;;  %s52_s10 = sld [smem:[#allocation3]]  ;;  %s819_s11 = sld [smem:[#allocation3 + $0x1]]  ;;  %v167_v0 = vld [vmem:[%s1465_s4] sm:$0xff]  ;;  %v168_v1 = vld [vmem:[%s1465_s4 + $0x8] sm:$0xff] }
  0x2c   :  { %v169_v2 = vld [vmem:[%s1465_s4 + $0x10] sm:$0xff]  ;;  %v1027_v4 = vpack.c.bf16 %v168_v1, %v167_v0  ;;  %v170_v5 = vld [vmem:[%s1465_s4 + $0x18] sm:$0xff]  ;;  %v171_v8 = vld [vmem:[%s1465_s4 + $0x20] sm:$0xff]  ;;  %vm142_vm0 = vcmask 523264   ;;  %vm323_vm1 = vcmask 261120  }
  0x2d   :  { %v1031_v7 = vpack.c.bf16 %v170_v5, %v169_v2  ;;  %v172_v9 = vld [vmem:[%s1465_s4 + $0x28] sm:$0xff]  ;;  %v53_v10 = vld [vmem:[%s1463_s2] sm:$0xff]  ;;  %v173_v15 = vld [vmem:[%s1465_s4 + $0x30] sm:$0xff] }
  0x2e   :  { %1028 = vmatprep.subr.bf16.mxu0 %v1027_v4  ;;  %v820_v12 = vld [vmem:[%s1463_s2 + $0x40] sm:$0xff]  ;;  %v1035_v14 = vpack.c.bf16 %v172_v9, %v171_v8  ;;  %v174_v16 = vld [vmem:[%s1465_s4 + $0x38] sm:$0xff]  ;;  %v54_v18 = vld [vmem:[%s1463_s2 + $0x8] sm:$0xff] }
  0x2f   :  { %1030 = vmatpush3.bf16.msra.mxu0 %v1027_v4  ;;  %v821_v19 = vld [vmem:[%s1463_s2 + $0x48] sm:$0xff]  ;;  %v175_v20 = vld [vmem:[%s1466_s5] sm:$0xff]  ;;  %v177_v22 = vld [vmem:[%s1466_s5 + $0x10] sm:$0xff]  ;;  %v1039_v23 = vpack.c.bf16 %v174_v16, %v173_v15 }
  0x30   :  { %1032 = vmatprep.subr.bf16.mxu0 %v1031_v7  ;;  %v176_v21 = vld [vmem:[%s1466_s5 + $0x8] sm:$0xff]  ;;  %v55_v24 = vld [vmem:[%s1463_s2 + $0x10] sm:$0xff]  ;;  %v178_v26 = vld [vmem:[%s1466_s5 + $0x18] sm:$0xff] }
  0x31   :  { %v1244_v3 = vstv %s52_s10  ;;  %v1249_v6 = vstv %s819_s11  ;;  %v822_v25 = vld [vmem:[%s1463_s2 + $0x50] sm:$0xff]  ;;  %v1043_v27 = vpack.c.bf16 %v176_v21, %v175_v20  ;;  %v1047_v28 = vpack.c.bf16 %v178_v26, %v177_v22  ;;  %v56_v33 = vld [vmem:[%s1463_s2 + $0x18] sm:$0xff] }
  0x32   :  { %v62_v11 = vmul.f32 %v1244_v3, %v53_v10  ;;  %v81_v13 = vmul.f32 %v820_v12, %v1249_v6  ;;  %v63_v29 = vmul.f32 %v1244_v3, %v54_v18  ;;  %v82_v30 = vmul.f32 %v821_v19, %v1249_v6  ;;  %v823_v34 = vld [vmem:[%s1463_s2 + $0x58] sm:$0xff]  ;;  %v57_v35 = vld [vmem:[%s1463_s2 + $0x20] sm:$0xff]  ;;  %v58_v43 = vld [vmem:[%s1463_s2 + $0x28] sm:$0xff] }
  0x33   :  { %1034 = vmatpush3.bf16.msra.mxu0 %v1031_v7  ;;  %v64_v31 = vmul.f32 %v1244_v3, %v55_v24  ;;  %v83_v32 = vmul.f32 %v822_v25, %v1249_v6  ;;  %1044 = vmatprep.subr.bf16.mxu1 %v1043_v27  ;;  %v824_v36 = vld [vmem:[%s1463_s2 + $0x60] sm:$0xff]  ;;  %v65_v38 = vmul.f32 %v1244_v3, %v56_v33  ;;  %v825_v44 = vld [vmem:[%s1463_s2 + $0x68] sm:$0xff]  ;;  %v59_v45 = vld [vmem:[%s1463_s2 + $0x30] sm:$0xff] }
  0x34   :  { %v89_v17 = vadd.f32 %v81_v13, %v62_v11  ;;  %1036 = vmatprep.subr.bf16.mxu0 %v1035_v14  ;;  %1046 = vmatpush3.bf16.msra.mxu1 %v1043_v27  ;;  %v90_v37 = vadd.f32 %v82_v30, %v63_v29  ;;  %v84_v39 = vmul.f32 %v823_v34, %v1249_v6  ;;  %v826_v46 = vld [vmem:[%s1463_s2 + $0x70] sm:$0xff]  ;;  %v60_v53 = vld [vmem:[%s1463_s2 + $0x38] sm:$0xff]  ;;  %v477_v62 = vld [vmem:[%s1468_s7] sm:$0xff] }
  0x35   :  { %1048 = vmatprep.subr.bf16.mxu1 %v1047_v28  ;;  %v91_v40 = vadd.f32 %v83_v32, %v64_v31  ;;  %v66_v41 = vmul.f32 %v1244_v3, %v57_v35  ;;  %v85_v42 = vmul.f32 %v824_v36, %v1249_v6  ;;  %v67_v48 = vmul.f32 %v1244_v3, %v58_v43  ;;  %v827_v54 = vld [vmem:[%s1463_s2 + $0x78] sm:$0xff]  ;;  %v478_v63 = vld [vmem:[%s1468_s7 + $0x8] sm:$0xff]  ;;  %v479_v7 = vld [vmem:[%s1468_s7 + $0x10] sm:$0xff] }
  0x36   :  { %939 = vmatprep.mubr.msk.f32.mxu0 %vm142_vm0, %v89_v17  ;;  %v92_v47 = vadd.f32 %v84_v39, %v65_v38  ;;  %v86_v49 = vmul.f32 %v825_v44, %v1249_v6  ;;  %v68_v51 = vmul.f32 %v1244_v3, %v59_v45  ;;  %v87_v52 = vmul.f32 %v826_v46, %v1249_v6  ;;  %v480_v8 = vld [vmem:[%s1468_s7 + $0x18] sm:$0xff]  ;;  %v481_v18 = vld [vmem:[%s1468_s7 + $0x20] sm:$0xff]  ;;  %v482_v19 = vld [vmem:[%s1468_s7 + $0x28] sm:$0xff] }
  0x37   :  { %1038 = vmatpush3.bf16.msra.mxu0 %v1035_v14  ;;  %v93_v50 = vadd.f32 %v85_v42, %v66_v41  ;;  %v69_v56 = vmul.f32 %v1244_v3, %v60_v53  ;;  %v88_v57 = vmul.f32 %v827_v54, %v1249_v6  ;;  %v143_v60 = vsel %vm142_vm0, %v89_v17, 0.0  ;;  %v483_v21 = vld [vmem:[%s1468_s7 + $0x30] sm:$0xff]  ;;  %v484_v22 = vld [vmem:[%s1468_s7 + $0x38] sm:$0xff]  ;;  %s828_s7 = sld [smem:[#allocation4 + $0x1]] }
  0x38   :  { %1040 = vmatprep.subr.bf16.mxu0 %v1039_v23  ;;  %1050 = vmatpush3.bf16.msra.mxu1 %v1047_v28  ;;  %v94_v55 = vadd.f32 %v86_v49, %v67_v48  ;;  %v95_v58 = vadd.f32 %v87_v52, %v68_v51  ;;  %v149_v61 = vsel %vm142_vm0, %v91_v40, 0.0  ;;  %v146_v0 = vsel %vm142_vm0, %v90_v37, 0.0  ;;  %v837_v28 = vld [vmem:[%s1467_s6] ss:$0 sm:$0xff]  ;;  %s97_s6 = sld [smem:[#allocation4]] }
  0x39   :  { %v96_v59 = vadd.f32 %v88_v57, %v69_v56  ;;  %144 = vadd.xlane.f32.xlu0 %v143_v60  ;;  %150 = vadd.xlane.f32.xlu1 %v149_v61  ;;  %v152_v1 = vsel %vm142_vm0, %v92_v47, 0.0  ;;  %v1051_v2 = vpack.c.bf16 %v478_v63, %v477_v62  ;;  %v155_v4 = vsel %vm142_vm0, %v93_v50, 0.0 }
  0x3a   :  { %v158_v3 = vsel %vm142_vm0, %v94_v55, 0.0  ;;  %v161_v6 = vsel %vm142_vm0, %v95_v58, 0.0  ;;  %v1055_v11 = vpack.c.bf16 %v480_v8, %v479_v7  ;;  %v1059_v20 = vpack.c.bf16 %v482_v19, %v481_v18 }
  0x3b   :  { %1042 = vmatpush3.bf16.msra.mxu0 %v1039_v23  ;;  %1052 = vmatprep.subr.bf16.mxu1 %v1051_v2  ;;  %v164_v5 = vsel %vm142_vm0, %v96_v59, 0.0  ;;  %v1063_v23 = vpack.c.bf16 %v484_v22, %v483_v21  ;;  %v100_v21 = vld [vmem:[#allocation5 + $0x10] sm:$0xff] }
  0x3c   :  { %v119_v22 = vld [vmem:[#allocation5 + $0x50] sm:$0xff] }
  0x3d   :  { %147 = vadd.xlane.f32.xlu0 %v146_v0  ;;  %153 = vadd.xlane.f32.xlu1 %v152_v1 }
  0x3e   :  { %940 = vmatmul.mubr.msk.f32.vlgmr.msra.gmra.mrb[0].mxu0 %vm142_vm0, %v90_v37 }
  0x3f   :  { %942 = vmatprep.mubr.msk.f32.mxu0 %vm142_vm0, %v91_v40 }
  0x41   :  { %159 = vadd.xlane.f32.xlu1 %v158_v3  ;;  %156 = vadd.xlane.f32.xlu0 %v155_v4 }
  0x42   :  { %943 = vmatmul.mubr.msk.f32.gmra.mrb[2].mxu0 %vm142_vm0, %v92_v47 }
  0x43   :  { %945 = vmatprep.mubr.msk.f32.mxu0 %vm142_vm0, %v93_v50 }
  0x45   :  { %165 = vadd.xlane.f32.xlu1 %v164_v5  ;;  %162 = vadd.xlane.f32.xlu0 %v161_v6 }
  0x46   :  { %946 = vmatmul.mubr.msk.f32.gmra.mrb[4].mxu0 %vm142_vm0, %v94_v55 }
  0x47   :  { %948 = vmatprep.mubr.msk.f32.mxu0 %vm142_vm0, %v95_v58 }
  0x4a   :  { %949 = vmatmul.mubr.msk.f32.gmra.mrb[6].mxu0 %vm142_vm0, %v96_v59 }
  0xc6   :  { %v145_v24 = vpop.xlane.xlu0 %144  ;;  %v151_v25 = vpop.xlane.xlu1 %150 }
  0xc7   :  { %v315_v30 = vmul.f32 %v837_v28, %v145_v24  ;;  %v317_v39 = vmul.f32 %v837_v28, %v151_v25  ;;  %v101_v25 = vld [vmem:[#allocation5 + $0x18] sm:$0xff] }
  0xca   :  { %v148_v26 = vpop.xlane.xlu0 %147  ;;  %v154_v27 = vpop.xlane.xlu1 %153 }
  0xcb   :  { %v316_v29 = vmul.f32 %v837_v28, %v148_v26  ;;  %v318_v35 = vmul.f32 %v837_v28, %v154_v27  ;;  %v120_v26 = vld [vmem:[#allocation5 + $0x58] sm:$0xff] }
  0xce   :  { %v160_v32 = vpop.xlane.xlu1 %159  ;;  %v157_v36 = vpop.xlane.xlu0 %156 }
  0xcf   :  { %v320_v44 = vmul.f32 %v837_v28, %v160_v32  ;;  %v319_v47 = vmul.f32 %v837_v28, %v157_v36  ;;  %v121_v32 = vld [vmem:[#allocation5 + $0x60] sm:$0xff]  ;;  %v122_v36 = vld [vmem:[#allocation5 + $0x68] sm:$0xff] }
  0xd2   :  { %v166_v48 = vpop.xlane.xlu1 %165  ;;  %v163_v51 = vpop.xlane.xlu0 %162 }
  0xd3   :  { %v322_v56 = vmul.f32 %v837_v28, %v166_v48  ;;  %v321_v59 = vmul.f32 %v837_v28, %v163_v51  ;;  %v846_v51 = vld [vmem:[%s1469_s8] ss:$0 sm:$0xff] }
 0x111   :  { %v941_v9 = vpop.f32.mrb[0].mxu0 }
 0x112   :  { %v270_v10 = vpop.f32.mrb[1].mxu0 }
 0x113   :  { %959 = vmatprep.mubr.msk.f32.mxu1 %vm323_vm1, %v270_v10  ;;  %v106_v10 = vstv %s97_s6 }
 0x114   :  { %960 = vmatmul.mubr.msk.f32.vlgmr.msra.gmra.mrb[0].mxu1 %vm323_vm1, %v941_v9  ;;  %v98_v9 = vld [vmem:[#allocation5] sm:$0xff]  ;;  %v110_v27 = vmul.f32 %v106_v10, %v101_v25 }
 0x115   :  { %v944_v12 = vpop.f32.mrb[2].mxu0  ;;  %1054 = vmatpush3.bf16.msra.mxu1 %v1051_v2 }
 0x116   :  { %v280_v13 = vpop.f32.mrb[3].mxu0  ;;  %1056 = vmatprep.subr.bf16.mxu1 %v1055_v11 }
 0x117   :  { %962 = vmatprep.mubr.msk.f32.mxu1 %vm323_vm1, %v280_v13  ;;  %v107_v13 = vmul.f32 %v106_v10, %v98_v9 }
 0x118   :  { %963 = vmatmul.mubr.msk.f32.gmra.mrb[2].mxu1 %vm323_vm1, %v944_v12  ;;  %v125_v12 = vstv %s828_s7 }
 0x119   :  { %v947_v14 = vpop.f32.mrb[4].mxu0  ;;  %1058 = vmatpush3.bf16.msra.mxu1 %v1055_v11  ;;  %v117_v11 = vld [vmem:[#allocation5 + $0x40] sm:$0xff]  ;;  %v128_v24 = vmul.f32 %v125_v12, %v119_v22  ;;  %v129_v28 = vmul.f32 %v125_v12, %v120_v26 }
 0x11a   :  { %v290_v15 = vpop.f32.mrb[5].mxu0  ;;  %1060 = vmatprep.subr.bf16.mxu1 %v1059_v20 }
 0x11b   :  { %965 = vmatprep.mubr.msk.f32.mxu1 %vm323_vm1, %v290_v15  ;;  %v99_v15 = vld [vmem:[#allocation5 + $0x8] sm:$0xff] }
 0x11c   :  { %966 = vmatmul.mubr.msk.f32.gmra.mrb[4].mxu1 %vm323_vm1, %v947_v14  ;;  %v126_v14 = vmul.f32 %v125_v12, %v117_v11 }
 0x11d   :  { %v950_v16 = vpop.f32.mrb[6].mxu0  ;;  %1062 = vmatpush3.bf16.msra.mxu1 %v1059_v20 }
 0x11e   :  { %v300_v17 = vpop.f32.mrb[7].mxu0  ;;  %1064 = vmatprep.subr.bf16.mxu1 %v1063_v23  ;;  %v134_v19 = vadd.f32 %v126_v14, %v107_v13 }
 0x11f   :  { %968 = vmatprep.mubr.msk.f32.mxu1 %vm323_vm1, %v300_v17  ;;  %v108_v17 = vmul.f32 %v106_v10, %v99_v15 }
 0x120   :  { %969 = vmatmul.mubr.msk.f32.gmra.mrb[6].mxu1 %vm323_vm1, %v950_v16  ;;  %v118_v16 = vld [vmem:[#allocation5 + $0x48] sm:$0xff]  ;;  %1015 = vmatprep.mubr.msk.f32.mxu0 %vm142_vm0, %v134_v19 }
 0x121   :  { %1066 = vmatpush3.bf16.msra.mxu1 %v1063_v23  ;;  %v127_v18 = vmul.f32 %v125_v12, %v118_v16  ;;  %v109_v23 = vmul.f32 %v106_v10, %v100_v21 }
 0x123   :  { %v1398_v20 = vadd.f32 %v127_v18, %v108_v17 }
 0x1e7   :  { %v961_v31 = vpop.f32.mrb[0].mxu1 }
 0x1e8   :  { %v420_v33 = vadd.f32 %v961_v31, %v316_v29  ;;  %v414_v34 = vpop.f32.mrb[1].mxu1  ;;  %v136_v29 = vadd.f32 %v128_v24, %v109_v23  ;;  %v102_v31 = vld [vmem:[#allocation5 + $0x20] sm:$0xff] }
 0x1e9   :  { %v415_v37 = vadd.f32 %v414_v34, %v315_v30  ;;  %v137_v30 = vadd.f32 %v129_v28, %v110_v27  ;;  %v130_v34 = vmul.f32 %v125_v12, %v121_v32 }
 0x1ea   :  { %v462_v38 = vmul.f32 0.2, %v420_v33  ;;  %vm454_vm2 = vcmp.ge.f32.partialorder %v420_v33, 0.0 }
 0x1eb   :  { %vm453_vm3 = vcmp.ge.f32.partialorder %v415_v37, 0.0  ;;  %v461_v40 = vmul.f32 0.2, %v415_v37  ;;  %v964_v41 = vpop.f32.mrb[2].mxu1 }
 0x1ec   :  { %v430_v42 = vadd.f32 %v964_v41, %v318_v35  ;;  %v424_v43 = vpop.f32.mrb[3].mxu1  ;;  %v470_v49 = vsel %vm454_vm2, %v420_v33, %v462_v38  ;;  %v111_v33 = vmul.f32 %v106_v10, %v102_v31  ;;  %v103_v35 = vld [vmem:[#allocation5 + $0x28] sm:$0xff]  ;;  %v131_v38 = vmul.f32 %v125_v12, %v122_v36  ;;  %v123_v41 = vld [vmem:[#allocation5 + $0x70] sm:$0xff] }
 0x1ed   :  { %v425_v45 = vadd.f32 %v424_v43, %v317_v39  ;;  %v469_v46 = vsel %vm453_vm3, %v415_v37, %v461_v40  ;;  %v112_v37 = vmul.f32 %v106_v10, %v103_v35  ;;  %v104_v40 = vld [vmem:[#allocation5 + $0x30] sm:$0xff] }
 0x1ee   :  { %v464_v50 = vmul.f32 0.2, %v430_v42  ;;  %987 = vmatprep.mubr.msk.f32.mxu1 %vm142_vm0, %v469_v46  ;;  %vm456_vm4 = vcmp.ge.f32.partialorder %v430_v42, 0.0  ;;  %v138_v39 = vadd.f32 %v130_v34, %v111_v33  ;;  %v113_v43 = vmul.f32 %v106_v10, %v104_v40  ;;  %v124_v46 = vld [vmem:[#allocation5 + $0x78] sm:$0xff] }
 0x1ef   :  { %vm455_vm5 = vcmp.ge.f32.partialorder %v425_v45, 0.0  ;;  %v463_v52 = vmul.f32 0.2, %v425_v45  ;;  %v967_v53 = vpop.f32.mrb[4].mxu1  ;;  %988 = vmatmul.mubr.msk.f32.vlgmr.msra.gmra.mrb[8].mxu1 %vm142_vm0, %v470_v49  ;;  %v133_v48 = vmul.f32 %v125_v12, %v124_v46 }
 0x1f0   :  { %v440_v54 = vadd.f32 %v967_v53, %v320_v44  ;;  %v434_v55 = vpop.f32.mrb[5].mxu1  ;;  %v472_v61 = vsel %vm456_vm4, %v430_v42, %v464_v50  ;;  %v139_v42 = vadd.f32 %v131_v38, %v112_v37  ;;  %v132_v44 = vmul.f32 %v125_v12, %v123_v41 }
 0x1f1   :  { %v435_v57 = vadd.f32 %v434_v55, %v319_v47  ;;  %v471_v58 = vsel %vm455_vm5, %v425_v45, %v463_v52  ;;  %v105_v45 = vld [vmem:[#allocation5 + $0x38] sm:$0xff] }
 0x1f2   :  { %v466_v60 = vmul.f32 0.2, %v440_v54  ;;  %990 = vmatprep.mubr.msk.f32.mxu1 %vm142_vm0, %v471_v58  ;;  %vm458_vm6 = vcmp.ge.f32.partialorder %v440_v54, 0.0  ;;  %v114_v47 = vmul.f32 %v106_v10, %v105_v45  ;;  %v140_v49 = vadd.f32 %v132_v44, %v113_v43 }
 0x1f3   :  { %vm457_vm7 = vcmp.ge.f32.partialorder %v435_v57, 0.0  ;;  %v465_v62 = vmul.f32 0.2, %v435_v57  ;;  %v970_v63 = vpop.f32.mrb[6].mxu1  ;;  %991 = vmatmul.mubr.msk.f32.gmra.mrb[10].mxu1 %vm142_vm0, %v472_v61 }
 0x1f4   :  { %v450_v0 = vadd.f32 %v970_v63, %v322_v56  ;;  %v444_v1 = vpop.f32.mrb[7].mxu1  ;;  %v474_v5 = vsel %vm458_vm6, %v440_v54, %v466_v60  ;;  %v141_v50 = vadd.f32 %v133_v48, %v114_v47 }
 0x1f5   :  { %v445_v2 = vadd.f32 %v444_v1, %v321_v59  ;;  %v473_v3 = vsel %vm457_vm7, %v435_v57, %v465_v62 }
 0x1f6   :  { %v468_v4 = vmul.f32 0.2, %v450_v0  ;;  %993 = vmatprep.mubr.msk.f32.mxu1 %vm142_vm0, %v473_v3  ;;  %vm460_vm8 = vcmp.ge.f32.partialorder %v450_v0, 0.0 }
 0x1f7   :  { %vm459_vm9 = vcmp.ge.f32.partialorder %v445_v2, 0.0  ;;  %v467_v6 = vmul.f32 0.2, %v445_v2  ;;  %994 = vmatmul.mubr.msk.f32.gmra.mrb[12].mxu1 %vm142_vm0, %v474_v5 }
 0x1f8   :  { %v476_v8 = vsel %vm460_vm8, %v450_v0, %v468_v4 }
 0x1f9   :  { %v475_v7 = vsel %vm459_vm9, %v445_v2, %v467_v6 }
 0x1fa   :  { %996 = vmatprep.mubr.msk.f32.mxu1 %vm142_vm0, %v475_v7 }
 0x1fb   :  { %997 = vmatmul.mubr.msk.f32.gmra.mrb[14].mxu1 %vm142_vm0, %v476_v8 }
 0x1fc   :  { %1024 = vmatprep.mubr.msk.f32.mxu1 %vm142_vm0, %v140_v49 }
 0x2c2   :  { %v989_v52 = vpop.f32.mrb[8].mxu1 }
 0x2c3   :  { %v588_v53 = vadd.f32 %v989_v52, %v846_v51  ;;  %v582_v54 = vpop.f32.mrb[9].mxu1 }
 0x2c4   :  { %v583_v55 = vadd.f32 %v846_v51, %v582_v54 }
 0x2c6   :  { %v1067_v56 = vpack.c.bf16 %v588_v53, %v583_v55  ;;  %v992_v57 = vpop.f32.mrb[10].mxu1 }
 0x2c7   :  { %v598_v58 = vadd.f32 %v992_v57, %v846_v51  ;;  %v592_v59 = vpop.f32.mrb[11].mxu1 }
 0x2c8   :  { %v593_v60 = vadd.f32 %v846_v51, %v592_v59  ;;  %1068 = vmatprep.subr.bf16.mxu0 %v1067_v56  ;;  %1083 = vmatprep.subr.bf16.mxu1 %v1067_v56 }
 0x2c9   :  { %1070 = vmatpush3.bf16.msra.mxu0 %v1067_v56  ;;  %1087 = vmatpush3.bf16.msra.mxu1 %v1067_v56 }
 0x2ca   :  { %v1071_v61 = vpack.c.bf16 %v598_v58, %v593_v60  ;;  %v995_v62 = vpop.f32.mrb[12].mxu1 }
 0x2cb   :  { %v608_v63 = vadd.f32 %v995_v62, %v846_v51  ;;  %v602_v0 = vpop.f32.mrb[13].mxu1 }
 0x2cc   :  { %v603_v1 = vadd.f32 %v846_v51, %v602_v0  ;;  %1072 = vmatprep.subr.bf16.mxu0 %v1071_v61  ;;  %1084 = vmatprep.subr.bf16.mxu1 %v1071_v61 }
 0x2cd   :  { %1074 = vmatpush3.bf16.msra.mxu0 %v1071_v61  ;;  %1088 = vmatpush3.bf16.msra.mxu1 %v1071_v61 }
 0x2ce   :  { %v1075_v2 = vpack.c.bf16 %v608_v63, %v603_v1  ;;  %v998_v3 = vpop.f32.mrb[14].mxu1 }
 0x2cf   :  { %v618_v4 = vadd.f32 %v998_v3, %v846_v51  ;;  %v612_v5 = vpop.f32.mrb[15].mxu1 }
 0x2d0   :  { %v613_v6 = vadd.f32 %v846_v51, %v612_v5  ;;  %1076 = vmatprep.subr.bf16.mxu0 %v1075_v2  ;;  %1085 = vmatprep.subr.bf16.mxu1 %v1075_v2 }
 0x2d1   :  { %1078 = vmatpush3.bf16.msra.mxu0 %v1075_v2  ;;  %1089 = vmatpush3.bf16.msra.mxu1 %v1075_v2 }
 0x2d2   :  { %v1079_v7 = vpack.c.bf16 %v618_v4, %v613_v6 }
 0x2d4   :  { %1080 = vmatprep.subr.bf16.mxu0 %v1079_v7  ;;  %1086 = vmatprep.subr.bf16.mxu1 %v1079_v7 }
 0x2d5   :  { %1082 = vmatpush3.bf16.msra.mxu0 %v1079_v7  ;;  %1090 = vmatpush3.bf16.msra.mxu1 %v1079_v7 }
 0x2d8   :  { %1016 = vmatmul.mubr.msk.f32.vlgmr.msra.gmra.mrb[8].mxu0 %vm142_vm0, %v1398_v20  ;;  %1025 = vmatmul.mubr.msk.f32.vlgmr.msra.gmra.mrb[16].mxu1 %vm142_vm0, %v141_v50 }
 0x2d9   :  { %1018 = vmatprep.mubr.msk.f32.mxu0 %vm142_vm0, %v136_v29 }
 0x2dc   :  { %1019 = vmatmul.mubr.msk.f32.gmra.mrb[10].mxu0 %vm142_vm0, %v137_v30 }
 0x2dd   :  { %1021 = vmatprep.mubr.msk.f32.mxu0 %vm142_vm0, %v138_v39 }
 0x2e0   :  { %1022 = vmatmul.mubr.msk.f32.gmra.mrb[12].mxu0 %vm142_vm0, %v139_v42 }
 0x3ab   :  { %v1017_v8 = vpop.f32.mrb[8].mxu0  ;;  %v1412_v9 = vpop.f32.mrb[16].mxu1 }
 0x3ac   :  { %v751_v10 = vmul.f32 %v1017_v8, %v1017_v8  ;;  %v711_v11 = vpop.f32.mrb[9].mxu0  ;;  %v1414_v12 = vpop.f32.mrb[17].mxu1  ;;  %v757_v25 = vmul.f32 %v1412_v9, %v1412_v9 }
 0x3ad   :  { %v750_v13 = vmul.f32 %v711_v11, %v711_v11  ;;  %v756_v27 = vmul.f32 %v1414_v12, %v1414_v12 }
 0x3ae   :  { %v761_v14 = vsel %vm323_vm1, %v751_v10, 0.0  ;;  %v779_v30 = vsel %vm323_vm1, %v757_v25, 0.0 }
 0x3af   :  { %762 = vadd.xlane.f32.xlu1 %v761_v14  ;;  %v1020_v15 = vpop.f32.mrb[10].mxu0  ;;  %v758_v16 = vsel %vm323_vm1, %v750_v13, 0.0  ;;  %v776_v31 = vsel %vm323_vm1, %v756_v27, 0.0 }
 0x3b0   :  { %v753_v17 = vmul.f32 %v1020_v15, %v1020_v15  ;;  %759 = vadd.xlane.f32.xlu0 %v758_v16  ;;  %v721_v18 = vpop.f32.mrb[11].mxu0 }
 0x3b1   :  { %v752_v19 = vmul.f32 %v721_v18, %v721_v18 }
 0x3b2   :  { %v767_v20 = vsel %vm323_vm1, %v753_v17, 0.0 }
 0x3b3   :  { %768 = vadd.xlane.f32.xlu1 %v767_v20  ;;  %v1023_v21 = vpop.f32.mrb[12].mxu0  ;;  %v764_v22 = vsel %vm323_vm1, %v752_v19, 0.0 }
 0x3b4   :  { %v755_v23 = vmul.f32 %v1023_v21, %v1023_v21  ;;  %765 = vadd.xlane.f32.xlu0 %v764_v22  ;;  %v731_v24 = vpop.f32.mrb[13].mxu0 }
 0x3b5   :  { %v754_v26 = vmul.f32 %v731_v24, %v731_v24 }
 0x3b6   :  { %v773_v28 = vsel %vm323_vm1, %v755_v23, 0.0 }
 0x3b7   :  { %774 = vadd.xlane.f32.xlu1 %v773_v28  ;;  %v770_v29 = vsel %vm323_vm1, %v754_v26, 0.0 }
 0x3b8   :  { %771 = vadd.xlane.f32.xlu0 %v770_v29 }
 0x3bb   :  { %780 = vadd.xlane.f32.xlu1 %v779_v30 }
 0x3bc   :  { %777 = vadd.xlane.f32.xlu0 %v776_v31 }
 0x43c   :  { %v763_v32 = vpop.xlane.xlu1 %762 }
 0x43d   :  { %v783_v33 = vmax.f32 %v763_v32, 1e-24  ;;  %v760_v34 = vpop.xlane.xlu0 %759 }
 0x43e   :  { %v782_v35 = vmax.f32 %v760_v34, 1e-24 }
 0x43f   :  { %1096 = vrsqrt.f32 %v783_v33 }
 0x440   :  { %1098 = vrsqrt.f32 %v782_v35  ;;  %v769_v36 = vpop.xlane.xlu1 %768 }
 0x441   :  { %v785_v37 = vmax.f32 %v769_v36, 1e-24  ;;  %v766_v38 = vpop.xlane.xlu0 %765 }
 0x442   :  { %v784_v39 = vmax.f32 %v766_v38, 1e-24 }
 0x443   :  { %1100 = vrsqrt.f32 %v785_v37 }
 0x444   :  { %1102 = vrsqrt.f32 %v784_v39  ;;  %v775_v40 = vpop.xlane.xlu1 %774 }
 0x445   :  { %v787_v41 = vmax.f32 %v775_v40, 1e-24  ;;  %v772_v42 = vpop.xlane.xlu0 %771 }
 0x446   :  { %v786_v43 = vmax.f32 %v772_v42, 1e-24 }
 0x447   :  { %1104 = vrsqrt.f32 %v787_v41 }
 0x448   :  { %1106 = vrsqrt.f32 %v786_v43  ;;  %v781_v44 = vpop.xlane.xlu1 %780 }
 0x449   :  { %v1097_v45 = vpop.eup %1096  ;;  %v789_v46 = vmax.f32 %v781_v44, 1e-24  ;;  %v778_v47 = vpop.xlane.xlu0 %777 }
 0x44a   :  { %v1099_v48 = vpop.eup %1098  ;;  %v799_v49 = vmul.f32 %v1097_v45, %v1017_v8  ;;  %v788_v50 = vmax.f32 %v778_v47, 1e-24 }
 0x44b   :  { %v798_v51 = vmul.f32 %v1099_v48, %v711_v11  ;;  %1108 = vrsqrt.f32 %v789_v46 }
 0x44c   :  { %807 = vst.msk [vmem:[%s1470_s9 + $0x8] sm:$0xff] %vm323_vm1, %v799_v49  ;;  %1110 = vrsqrt.f32 %v788_v50 }
 0x44d   :  { %v1101_v52 = vpop.eup %1100  ;;  %806 = vst.msk [vmem:[%s1470_s9] sm:$0xff] %vm323_vm1, %v798_v51 }
 0x44e   :  { %v1103_v53 = vpop.eup %1102  ;;  %v801_v54 = vmul.f32 %v1101_v52, %v1020_v15 }
 0x44f   :  { %v800_v55 = vmul.f32 %v1103_v53, %v721_v18 }
 0x450   :  { %809 = vst.msk [vmem:[%s1470_s9 + $0x18] sm:$0xff] %vm323_vm1, %v801_v54 }
 0x451   :  { %v1105_v56 = vpop.eup %1104  ;;  %808 = vst.msk [vmem:[%s1470_s9 + $0x10] sm:$0xff] %vm323_vm1, %v800_v55 }
 0x452   :  { %v1107_v57 = vpop.eup %1106  ;;  %v803_v58 = vmul.f32 %v1105_v56, %v1023_v21 }
 0x453   :  { %v802_v59 = vmul.f32 %v1107_v57, %v731_v24 }
 0x454   :  { %811 = vst.msk [vmem:[%s1470_s9 + $0x28] sm:$0xff] %vm323_vm1, %v803_v58 }
 0x455   :  { %v1109_v60 = vpop.eup %1108  ;;  %810 = vst.msk [vmem:[%s1470_s9 + $0x20] sm:$0xff] %vm323_vm1, %v802_v59 }
 0x456   :  { %v1111_v61 = vpop.eup %1110  ;;  %v805_v62 = vmul.f32 %v1109_v60, %v1412_v9 }
 0x457   :  { %v804_v63 = vmul.f32 %v1111_v61, %v1414_v12 }
 0x458   :  { %813 = vst.msk [vmem:[%s1470_s9 + $0x38] sm:$0xff] %vm323_vm1, %v805_v62 }
 0x459   :  { %812 = vst.msk [vmem:[%s1470_s9 + $0x30] sm:$0xff] %vm323_vm1, %v804_v63 }
 0x45a   :  { %818 = vsyncpa [#allocation6], 1 }

</bundles_post_ra>
